<compile_context>
chip_gen: v5e
topology: v5e:2x2
jax: 0.10.0
libtpu: 0.0.40
codegen_flags: <defaults>
</compile_context>

<pallas_src>
import numpy as np
import jax
import jax.numpy as jnp
from jax.experimental import pallas as pl
from jax.experimental.pallas import tpu as pltpu


def _vmem_limit_bytes():
    """Scoped-VMEM budget: ~3/4 of physical (96 MiB on v5e/v6e, 48 MiB on v7x)."""
    phys = 64 * 1024 * 1024
    try:
        info = pltpu.get_tpu_info()
        phys = int(getattr(info, "vmem_capacity_bytes", 0) or phys)
    except Exception:
        pass
    return int(min(phys * 3 // 4, 96 * 1024 * 1024))


VMEM_LIMIT_BYTES = _vmem_limit_bytes()

# Lane-dense output-channel tile.  128 everywhere; on v6e/v7x with Cout >= 512
# a 256-wide tile would fill the 2x256^2 MXU N dim (re-check VMEM on v7x).
_PREFERRED_TCOUT = 128


def _round_up(x, m):
    return (x + m - 1) // m * m


def _padded_cout(cout):
    """Pad Cout to a 128 multiple when tiled; keep full dim when small."""
    return cout if cout <= _PREFERRED_TCOUT else _round_up(cout, _PREFERRED_TCOUT)


def _cout_tile(coutp):
    return coutp if coutp <= _PREFERRED_TCOUT else _PREFERRED_TCOUT


def _pick_batch_tile(n, ho, wo, nco):
    """Images per grid step: raise matmul M (= Nb*Ho*Wo) toward >= 256 while
    keeping at least 2 grid points available for megacore sharding."""
    nb = 1
    while (nb * ho * wo < 256 and nb * 2 <= n and n % (nb * 2) == 0
           and (n // (nb * 2)) * nco >= 2):
        nb *= 2
    return nb


def _pad_axis(a, axis, to):
    c = a.shape[axis]
    if c == to:
        return a
    pad = [(0, 0)] * a.ndim
    pad[axis] = (0, to - c)
    return jnp.pad(a, pad)


# ---------------- Pallas kernels ----------------

def _make_conv1_kernel(taps, Nb, Ho, Wo, Hgp, Cin, tcout):
    """3x3 conv (stride folded into the phase-split input) as ONE merged-K MXU
    dot, fused with bn2 affine + relu2.  Writes a pre-padded output block
    (1-px zero halo) so conv2 needs no XLA pad."""
    M = Nb * Ho * Wo
    K = 9 * Cin

    def kernel(z_ref, w_ref, s2_ref, b2_ref, o_ref):
        pieces = [
            z_ref[:, g * Hgp + dy: g * Hgp + dy + Ho, dx:dx + Wo, :]
            .reshape(M, Cin)
            for (g, dy, dx) in taps
        ]
        patches = jnp.concatenate(pieces, axis=-1)            # (M, 9*Cin)
        acc = jnp.dot(patches, w_ref[...],
                      preferred_element_type=jnp.float32)     # (M, tcout)
        out = jnp.maximum(acc * s2_ref[...] + b2_ref[...], 0.0)  # bn2 + relu2
        o_ref[...] = jnp.zeros(o_ref.shape, o_ref.dtype)         # zero halo
        o_ref[:, 1:Ho + 1, 1:Wo + 1, :] = out.reshape(Nb, Ho, Wo, tcout)

    return kernel


def _make_conv2_kernel_identity(Nb, Ho, Wo, Cmid, tcout):
    """3x3 conv (stride 1, pre-padded input) as one merged-K dot + identity
    residual add."""
    M = Nb * Ho * Wo
    K = 9 * Cmid

    def kernel(hp_ref, w_ref, res_ref, o_ref):
        pieces = [
            hp_ref[:, dy:dy + Ho, dx:dx + Wo, :].reshape(M, Cmid)
            for dy in range(3) for dx in range(3)
        ]
        patches = jnp.concatenate(pieces, axis=-1)            # (M, 9*Cmid)
        acc = jnp.dot(patches, w_ref[...],
                      preferred_element_type=jnp.float32)
        o_ref[...] = acc.reshape(Nb, Ho, Wo, tcout) + res_ref[...]

    return kernel


def _make_conv2_kernel_shortcut(Nb, Ho, Wo, Cmid, sdy, sdx, Cin, tcout):
    """3x3 conv + 1x1 strided shortcut conv + residual add, all as ONE merged-K
    MXU dot (shortcut patch/weight rows appended to the contraction axis)."""
    M = Nb * Ho * Wo

    def kernel(hp_ref, zsc_ref, w_ref, o_ref):
        pieces = [
            hp_ref[:, dy:dy + Ho, dx:dx + Wo, :].reshape(M, Cmid)
            for dy in range(3) for dx in range(3)
        ]
        pieces.append(
            zsc_ref[:, sdy:sdy + Ho, sdx:sdx + Wo, :].reshape(M, Cin))
        patches = jnp.concatenate(pieces, axis=-1)            # (M, 9*Cmid+Cin)
        acc = jnp.dot(patches, w_ref[...],
                      preferred_element_type=jnp.float32)
        o_ref[...] = acc.reshape(Nb, Ho, Wo, tcout)

    return kernel


# ---------------- pallas_call wrappers ----------------

def _conv1_bn_relu(z4, w_flat, scale2, bias2, *, taps, Ho, Wo, Hgp):
    N, GH, Wgp, Cin = z4.shape
    K, Coutp = w_flat.shape
    tcout = _cout_tile(Coutp)
    nco = Coutp // tcout
    Nb = _pick_batch_tile(N, Ho, Wo, nco)

    flops = 2 * N * Ho * Wo * K * Coutp
    bytes_accessed = int(z4.size * z4.dtype.itemsize
                         + w_flat.size * w_flat.dtype.itemsize
                         + (scale2.size + bias2.size) * 4
                         + N * (Ho + 2) * (Wo + 2) * Coutp * 4)

    kernel = _make_conv1_kernel(taps, Nb, Ho, Wo, Hgp, Cin, tcout)
    return pl.pallas_call(
        kernel,
        out_shape=jax.ShapeDtypeStruct((N, Ho + 2, Wo + 2, Coutp), jnp.float32),
        grid=(N // Nb, nco),
        in_specs=[
            pl.BlockSpec((Nb, GH, Wgp, Cin), lambda b, co: (b, 0, 0, 0)),
            pl.BlockSpec((K, tcout), lambda b, co: (0, co)),
            pl.BlockSpec((1, tcout), lambda b, co: (0, co)),
            pl.BlockSpec((1, tcout), lambda b, co: (0, co)),
        ],
        out_specs=pl.BlockSpec((Nb, Ho + 2, Wo + 2, tcout),
                               lambda b, co: (b, 0, 0, co)),
        compiler_params=pltpu.CompilerParams(
            dimension_semantics=("parallel", "parallel"),
            vmem_limit_bytes=VMEM_LIMIT_BYTES),
        cost_estimate=pl.CostEstimate(flops=flops, transcendentals=0,
                                      bytes_accessed=bytes_accessed),
    )(z4, w_flat, scale2, bias2)


def _conv2_add_identity(hp, w_flat, res, *, Ho, Wo):
    N, Hp2, Wp2, Cmid = hp.shape
    K, Coutp = w_flat.shape
    tcout = _cout_tile(Coutp)
    nco = Coutp // tcout
    Nb = _pick_batch_tile(N, Ho, Wo, nco)

    flops = 2 * N * Ho * Wo * K * Coutp
    bytes_accessed = int(hp.size * hp.dtype.itemsize
                         + w_flat.size * w_flat.dtype.itemsize
                         + res.size * res.dtype.itemsize
                         + N * Ho * Wo * Coutp * 4)

    kernel = _make_conv2_kernel_identity(Nb, Ho, Wo, Cmid, tcout)
    return pl.pallas_call(
        kernel,
        out_shape=jax.ShapeDtypeStruct((N, Ho, Wo, Coutp), jnp.float32),
        grid=(N // Nb, nco),
        in_specs=[
            pl.BlockSpec((Nb, Hp2, Wp2, Cmid), lambda b, co: (b, 0, 0, 0)),
            pl.BlockSpec((K, tcout), lambda b, co: (0, co)),
            pl.BlockSpec((Nb, Ho, Wo, tcout), lambda b, co: (b, 0, 0, co)),
        ],
        out_specs=pl.BlockSpec((Nb, Ho, Wo, tcout), lambda b, co: (b, 0, 0, co)),
        compiler_params=pltpu.CompilerParams(
            dimension_semantics=("parallel", "parallel"),
            vmem_limit_bytes=VMEM_LIMIT_BYTES),
        cost_estimate=pl.CostEstimate(flops=flops, transcendentals=0,
                                      bytes_accessed=bytes_accessed),
    )(hp, w_flat, res)


def _conv2_add_shortcut(hp, z4, w_flat, *, Ho, Wo, sc_tap, Hgp_sc):
    N, Hp2, Wp2, Cmid = hp.shape
    _, GHs, Wgp_s, Cin = z4.shape
    K, Coutp = w_flat.shape                       # K = 9*Cmid + Cin
    sg, sdy, sdx = sc_tap
    n_groups = GHs // Hgp_sc
    tcout = _cout_tile(Coutp)
    nco = Coutp // tcout
    Nb = _pick_batch_tile(N, Ho, Wo, nco)

    flops = 2 * N * Ho * Wo * K * Coutp
    bytes_accessed = int(hp.size * hp.dtype.itemsize
                         + w_flat.size * w_flat.dtype.itemsize
                         + (z4.size // n_groups) * z4.dtype.itemsize
                         + N * Ho * Wo * Coutp * 4)

    kernel = _make_conv2_kernel_shortcut(Nb, Ho, Wo, Cmid, sdy, sdx, Cin, tcout)
    return pl.pallas_call(
        kernel,
        out_shape=jax.ShapeDtypeStruct((N, Ho, Wo, Coutp), jnp.float32),
        grid=(N // Nb, nco),
        in_specs=[
            pl.BlockSpec((Nb, Hp2, Wp2, Cmid), lambda b, co: (b, 0, 0, 0)),
            # Only the single phase group the 1x1 strided shortcut reads.
            pl.BlockSpec((Nb, Hgp_sc, Wgp_s, Cin), lambda b, co: (b, sg, 0, 0)),
            pl.BlockSpec((K, tcout), lambda b, co: (0, co)),
        ],
        out_specs=pl.BlockSpec((Nb, Ho, Wo, tcout), lambda b, co: (b, 0, 0, co)),
        compiler_params=pltpu.CompilerParams(
            dimension_semantics=("parallel", "parallel"),
            vmem_limit_bytes=VMEM_LIMIT_BYTES),
        cost_estimate=pl.CostEstimate(flops=flops, transcendentals=0,
                                      bytes_accessed=bytes_accessed),
    )(hp, z4, w_flat)


# ---------------- JAX glue ----------------

def _phase_split(zp, stride):
    """Zero-padded NHWC tensor -> (N, G*Hgp, Wgp, C) layout so every 3x3 tap
    (including stride 2) is a contiguous static in-kernel slice.
    Returns (z4, Hgp, conv taps [(group, dy, dx)], shortcut tap)."""
    N, Hp, Wp, C = zp.shape
    if stride == 1:
        taps = [(0, ky, kx) for ky in range(3) for kx in range(3)]
        return zp, Hp, taps, (0, 1, 1)
    assert stride == 2 and Hp % 2 == 0 and Wp % 2 == 0
    Hgp, Wgp = Hp // 2, Wp // 2
    z = zp.reshape(N, Hgp, 2, Wgp, 2, C).transpose(0, 2, 4, 1, 3, 5)
    z4 = z.reshape(N, 4 * Hgp, Wgp, C)            # group g = 2*(row%2) + (col%2)
    taps = [((ky % 2) * 2 + (kx % 2), ky // 2, kx // 2)
            for ky in range(3) for kx in range(3)]
    return z4, Hgp, taps, (3, 0, 0)               # 1x1 stride-2 shortcut tap


def init_basic_block_params(key, in_planes, out_planes, equal_in_out):
    ks = jax.random.split(key, 10)
    eps = 1e-5

    def bn_fold(kg, kb, km, kv, c):
        gamma = 1.0 + 0.1 * jax.random.normal(kg, (c,), jnp.float32)
        beta = 0.1 * jax.random.normal(kb, (c,), jnp.float32)
        mean = 0.1 * jax.random.normal(km, (c,), jnp.float32)
        var = jnp.abs(jax.random.normal(kv, (c,), jnp.float32)) + 0.5
        scale = gamma / jnp.sqrt(var + eps)
        bias = beta - mean * scale
        return scale.reshape(1, c), bias.reshape(1, c)

    scale1, bias1 = bn_fold(ks[0], ks[1], ks[2], ks[3], in_planes)
    scale2, bias2 = bn_fold(ks[4], ks[5], ks[6], ks[7], out_planes)
    w1 = 0.1 * jax.random.normal(ks[8], (3, 3, in_planes, out_planes), jnp.float32)
    w2 = 0.1 * jax.random.normal(ks[9], (3, 3, out_planes, out_planes), jnp.float32)
    params = dict(scale1=scale1, bias1=bias1, w1=w1,
                  scale2=scale2, bias2=bias2, w2=w2)
    if not equal_in_out:
        kws = jax.random.fold_in(key, 99)
        params["ws"] = 0.1 * jax.random.normal(
            kws, (1, 1, in_planes, out_planes), jnp.float32)
    return params


def basic_block_forward(x, params, stride, equal_in_out):
    """x: (N, H, W, Cin) float32, NHWC."""
    N, H, W, Cin = x.shape
    Cout = params["w1"].shape[-1]
    Coutp = _padded_cout(Cout)
    Ho, Wo = H // stride, W // stride

    # bn1 affine + relu1 (relu(0)=0 keeps the zero pad exact), zero-pad and (for
    # stride 2) phase-split: one XLA elementwise/layout producer for the single
    # HBM activation tensor the conv1 / shortcut kernels read.
    a = jnp.maximum(x * params["scale1"].reshape(1, 1, 1, Cin)
                    + params["bias1"].reshape(1, 1, 1, Cin), 0.0)
    zp = jnp.pad(a, ((0, 0), (1, 1), (1, 1), (0, 0)))
    z4, Hgp, taps, sc_tap = _phase_split(zp, stride)

    # conv1 (3x3, stride) as one merged-K MXU dot, fused with bn2 + relu2,
    # emitting a pre-padded (zero-halo) output for conv2.
    w1 = _pad_axis(params["w1"], 3, Coutp).reshape(9 * Cin, Coutp)
    s2 = _pad_axis(params["scale2"], 1, Coutp)
    b2 = _pad_axis(params["bias2"], 1, Coutp)
    hp = _conv1_bn_relu(z4, w1, s2, b2, taps=taps, Ho=Ho, Wo=Wo, Hgp=Hgp)

    # TODO(synk): droprate > 0 (F.dropout) and training-mode BatchNorm batch
    #             statistics are not implemented (module default droprate=0.0).

    # conv2 (3x3, stride 1) fused with the residual add; for the non-equal
    # case the 1x1 strided shortcut conv is folded into the same MXU dot.
    w2 = _pad_axis(_pad_axis(params["w2"], 3, Coutp), 2, Coutp)
    w2_flat = w2.reshape(9 * Coutp, Coutp)
    if equal_in_out:
        assert stride == 1
        res = _pad_axis(x, 3, Coutp)
        out = _conv2_add_identity(hp, w2_flat, res, Ho=Ho, Wo=Wo)
    else:
        ws = _pad_axis(params["ws"], 3, Coutp).reshape(Cin, Coutp)
        w_comb = jnp.concatenate([w2_flat, ws], axis=0)   # (9*Coutp + Cin, Coutp)
        out = _conv2_add_shortcut(hp, z4, w_comb, Ho=Ho, Wo=Wo,
                                  sc_tap=sc_tap, Hgp_sc=Hgp)
    return out if Coutp == Cout else out[..., :Cout]


# ---------------- pure-JAX reference (correctness check) ----------------

def _conv_nhwc(x, w, stride, pad):
    return jax.lax.conv_general_dilated(
        x, w, window_strides=(stride, stride),
        padding=((pad, pad), (pad, pad)),
        dimension_numbers=("NHWC", "HWIO", "NHWC"))


def basic_block_reference(x, params, stride, equal_in_out):
    a = jnp.maximum(x * params["scale1"].reshape(1, 1, 1, -1)
                    + params["bias1"].reshape(1, 1, 1, -1), 0.0)
    out = _conv_nhwc(a, params["w1"], stride, 1)
    out = jnp.maximum(out * params["scale2"].reshape(1, 1, 1, -1)
                      + params["bias2"].reshape(1, 1, 1, -1), 0.0)
    out = _conv_nhwc(out, params["w2"], 1, 1)
    sc = x if equal_in_out else _conv_nhwc(a, params["ws"], stride, 0)
    return sc + out


if __name__ == "__main__":
    key = jax.random.PRNGKey(0)
    kx, k1, k2, k3 = jax.random.split(key, 4)

    # PyTorch-style NCHW input, converted to the kernels' NHWC layout.
    x_nchw = jax.random.normal(kx, (2, 4, 16, 16), jnp.float32)
    x = jnp.transpose(x_nchw, (0, 2, 3, 1))          # NHWC (2, 16, 16, 4)

    fwd = jax.jit(basic_block_forward, static_argnames=("stride", "equal_in_out"))

    # Case 1: in_planes=4 != out_planes=8, stride=2 (fused convShortcut path)
    p1 = init_basic_block_params(k1, 4, 8, equal_in_out=False)
    y1 = jax.block_until_ready(fwd(x, p1, stride=2, equal_in_out=False))
    r1 = basic_block_reference(x, p1, 2, False)
    np.testing.assert_allclose(np.asarray(y1), np.asarray(r1), rtol=1e-4, atol=1e-4)

    # Case 2: in_planes=8 == out_planes=8, stride=1 (identity shortcut path)
    p2 = init_basic_block_params(k2, 8, 8, equal_in_out=True)
    y2 = jax.block_until_ready(fwd(y1, p2, stride=1, equal_in_out=True))
    r2 = basic_block_reference(y1, p2, 1, True)
    np.testing.assert_allclose(np.asarray(y2), np.asarray(r2), rtol=1e-4, atol=1e-4)

    # Case 3: in_planes=4 != out_planes=8, stride=1 (stride-1 convShortcut path)
    p3 = init_basic_block_params(k3, 4, 8, equal_in_out=False)
    y3 = jax.block_until_ready(fwd(x, p3, stride=1, equal_in_out=False))
    r3 = basic_block_reference(x, p3, 1, False)
    np.testing.assert_allclose(np.asarray(y3), np.asarray(r3), rtol=1e-4, atol=1e-4)

    print("KERNEL_OK")
</pallas_src>

<mosaic_0001>
module attributes {stable_mosaic.version = 11 : i64} {
  func.func @kernel(%arg0: i32, %arg1: i32, %arg2: memref<1x10x10x8xf32, #tpu.memory_space<vmem>>, %arg3: memref<1x9x9x4xf32, #tpu.memory_space<vmem>>, %arg4: memref<76x8xf32, #tpu.memory_space<vmem>>, %arg5: memref<1x8x8x8xf32, #tpu.memory_space<vmem>>) attributes {dimension_semantics = [#tpu.dimension_semantics<parallel>, #tpu.dimension_semantics<parallel>], iteration_bounds = array<i64: 2, 1>, scalar_prefetch = 0 : i64, scratch_operands = 0 : i64, tpu.core_type = #tpu.core_type<tc>, window_params = [{transform_indices = @transform_0, window_bounds = array<i64: 1, 10, 10, 8>}, {transform_indices = @transform_1, window_bounds = array<i64: 1, 9, 9, 4>}, {transform_indices = @transform_2, window_bounds = array<i64: 76, 8>}, {transform_indices = @transform_3, window_bounds = array<i64: 1, 8, 8, 8>}]} {
    %c0 = arith.constant 0 : index
    %c0_0 = arith.constant 0 : index
    %c0_1 = arith.constant 0 : index
    %c0_2 = arith.constant 0 : index
    %0 = vector.load %arg2[%c0, %c0_0, %c0_1, %c0_2] : memref<1x10x10x8xf32, #tpu.memory_space<vmem>>, vector<1x8x8x8xf32>
    %1 = vector.shape_cast %0 : vector<1x8x8x8xf32> to vector<64x8xf32>
    %c0_3 = arith.constant 0 : index
    %c0_4 = arith.constant 0 : index
    %c1 = arith.constant 1 : index
    %c0_5 = arith.constant 0 : index
    %2 = vector.load %arg2[%c0_3, %c0_4, %c1, %c0_5] : memref<1x10x10x8xf32, #tpu.memory_space<vmem>>, vector<1x8x8x8xf32>
    %3 = vector.shape_cast %2 : vector<1x8x8x8xf32> to vector<64x8xf32>
    %c0_6 = arith.constant 0 : index
    %c0_7 = arith.constant 0 : index
    %c2 = arith.constant 2 : index
    %c0_8 = arith.constant 0 : index
    %4 = vector.load %arg2[%c0_6, %c0_7, %c2, %c0_8] : memref<1x10x10x8xf32, #tpu.memory_space<vmem>>, vector<1x8x8x8xf32>
    %5 = vector.shape_cast %4 : vector<1x8x8x8xf32> to vector<64x8xf32>
    %c0_9 = arith.constant 0 : index
    %c1_10 = arith.constant 1 : index
    %c0_11 = arith.constant 0 : index
    %c0_12 = arith.constant 0 : index
    %6 = vector.load %arg2[%c0_9, %c1_10, %c0_11, %c0_12] : memref<1x10x10x8xf32, #tpu.memory_space<vmem>>, vector<1x8x8x8xf32>
    %7 = vector.shape_cast %6 : vector<1x8x8x8xf32> to vector<64x8xf32>
    %c0_13 = arith.constant 0 : index
    %c1_14 = arith.constant 1 : index
    %c1_15 = arith.constant 1 : index
    %c0_16 = arith.constant 0 : index
    %8 = vector.load %arg2[%c0_13, %c1_14, %c1_15, %c0_16] : memref<1x10x10x8xf32, #tpu.memory_space<vmem>>, vector<1x8x8x8xf32>
    %9 = vector.shape_cast %8 : vector<1x8x8x8xf32> to vector<64x8xf32>
    %c0_17 = arith.constant 0 : index
    %c1_18 = arith.constant 1 : index
    %c2_19 = arith.constant 2 : index
    %c0_20 = arith.constant 0 : index
    %10 = vector.load %arg2[%c0_17, %c1_18, %c2_19, %c0_20] : memref<1x10x10x8xf32, #tpu.memory_space<vmem>>, vector<1x8x8x8xf32>
    %11 = vector.shape_cast %10 : vector<1x8x8x8xf32> to vector<64x8xf32>
    %c0_21 = arith.constant 0 : index
    %c2_22 = arith.constant 2 : index
    %c0_23 = arith.constant 0 : index
    %c0_24 = arith.constant 0 : index
    %12 = vector.load %arg2[%c0_21, %c2_22, %c0_23, %c0_24] : memref<1x10x10x8xf32, #tpu.memory_space<vmem>>, vector<1x8x8x8xf32>
    %13 = vector.shape_cast %12 : vector<1x8x8x8xf32> to vector<64x8xf32>
    %c0_25 = arith.constant 0 : index
    %c2_26 = arith.constant 2 : index
    %c1_27 = arith.constant 1 : index
    %c0_28 = arith.constant 0 : index
    %14 = vector.load %arg2[%c0_25, %c2_26, %c1_27, %c0_28] : memref<1x10x10x8xf32, #tpu.memory_space<vmem>>, vector<1x8x8x8xf32>
    %15 = vector.shape_cast %14 : vector<1x8x8x8xf32> to vector<64x8xf32>
    %c0_29 = arith.constant 0 : index
    %c2_30 = arith.constant 2 : index
    %c2_31 = arith.constant 2 : index
    %c0_32 = arith.constant 0 : index
    %16 = vector.load %arg2[%c0_29, %c2_30, %c2_31, %c0_32] : memref<1x10x10x8xf32, #tpu.memory_space<vmem>>, vector<1x8x8x8xf32>
    %17 = vector.shape_cast %16 : vector<1x8x8x8xf32> to vector<64x8xf32>
    %c0_33 = arith.constant 0 : index
    %c0_34 = arith.constant 0 : index
    %c0_35 = arith.constant 0 : index
    %c0_36 = arith.constant 0 : index
    %18 = vector.load %arg3[%c0_33, %c0_34, %c0_35, %c0_36] : memref<1x9x9x4xf32, #tpu.memory_space<vmem>>, vector<1x8x8x4xf32>
    %19 = vector.shape_cast %18 : vector<1x8x8x4xf32> to vector<64x4xf32>
    %20 = tpu.concatenate %1, %3, %5, %7, %9, %11, %13, %15, %17, %19 in 1 : vector<64x8xf32>, vector<64x8xf32>, vector<64x8xf32>, vector<64x8xf32>, vector<64x8xf32>, vector<64x8xf32>, vector<64x8xf32>, vector<64x8xf32>, vector<64x8xf32>, vector<64x4xf32> -> vector<64x76xf32>
    %c0_37 = arith.constant 0 : index
    %c0_38 = arith.constant 0 : index
    %21 = vector.load %arg4[%c0_37, %c0_38] : memref<76x8xf32, #tpu.memory_space<vmem>>, vector<76x8xf32>
    %cst = arith.constant dense<0.000000e+00> : vector<64x8xf32>
    %22 = tpu.matmul %20, %21, %cst {dimension_numbers = #tpu.dot_dimension_numbers<[1], [0], [0], [1], [0, 0, 1, 1], [], []>} : vector<64x76xf32>, vector<76x8xf32>, vector<64x8xf32> -> vector<64x8xf32>
    %23 = vector.shape_cast %22 : vector<64x8xf32> to vector<1x8x8x8xf32>
    %c0_39 = arith.constant 0 : index
    %c0_40 = arith.constant 0 : index
    %c0_41 = arith.constant 0 : index
    %c0_42 = arith.constant 0 : index
    %24 = vector.load %arg5[%c0_39, %c0_40, %c0_41, %c0_42] : memref<1x8x8x8xf32, #tpu.memory_space<vmem>>, vector<1x8x8x8xf32>
    tpu.vector_store %arg5[%c0_39, %c0_40, %c0_41, %c0_42], %23 {strides = array<i32>} : memref<1x8x8x8xf32, #tpu.memory_space<vmem>>, vector<1x8x8x8xf32>,
    return
  }
  func.func @transform_0(%arg0: i32, %arg1: i32) -> (i32, i32, i32, i32) {
    %c0_i32 = arith.constant 0 : i32
    %c0_i32_0 = arith.constant 0 : i32
    %c0_i32_1 = arith.constant 0 : i32
    %c0_i32_2 = arith.constant 0 : i32
    return %arg0, %c0_i32, %c0_i32_0, %c0_i32_1 : i32, i32, i32, i32
  }
  func.func @transform_1(%arg0: i32, %arg1: i32) -> (i32, i32, i32, i32) {
    %c3_i32 = arith.constant 3 : i32
    %c0_i32 = arith.constant 0 : i32
    %c0_i32_0 = arith.constant 0 : i32
    %c0_i32_1 = arith.constant 0 : i32
    return %arg0, %c3_i32, %c0_i32, %c0_i32_0 : i32, i32, i32, i32
  }
  func.func @transform_2(%arg0: i32, %arg1: i32) -> (i32, i32) {
    %c0_i32 = arith.constant 0 : i32
    %c0_i32_0 = arith.constant 0 : i32
    return %c0_i32, %arg1 : i32, i32
  }
  func.func @transform_3(%arg0: i32, %arg1: i32) -> (i32, i32, i32, i32) {
    %c0_i32 = arith.constant 0 : i32
    %c0_i32_0 = arith.constant 0 : i32
    %c0_i32_1 = arith.constant 0 : i32
    return %arg0, %c0_i32, %c0_i32_0, %arg1 : i32, i32, i32, i32
  }
}

module attributes {stable_mosaic.version = 11 : i64} {
  func.func @kernel(%arg0: i32, %arg1: i32, %arg2: memref<1x36x9x4xf32, #tpu.memory_space<vmem>>, %arg3: memref<36x8xf32, #tpu.memory_space<vmem>>, %arg4: memref<1x8xf32, #tpu.memory_space<vmem>>, %arg5: memref<1x8xf32, #tpu.memory_space<vmem>>, %arg6: memref<1x10x10x8xf32, #tpu.memory_space<vmem>>) attributes {dimension_semantics = [#tpu.dimension_semantics<parallel>, #tpu.dimension_semantics<parallel>], iteration_bounds = array<i64: 2, 1>, scalar_prefetch = 0 : i64, scratch_operands = 0 : i64, tpu.core_type = #tpu.core_type<tc>, window_params = [{transform_indices = @transform_0, window_bounds = array<i64: 1, 36, 9, 4>}, {transform_indices = @transform_1, window_bounds = array<i64: 36, 8>}, {transform_indices = @transform_2, window_bounds = array<i64: 1, 8>}, {transform_indices = @transform_3, window_bounds = array<i64: 1, 8>}, {transform_indices = @transform_4, window_bounds = array<i64: 1, 10, 10, 8>}]} {
    %c0 = arith.constant 0 : index
    %c0_0 = arith.constant 0 : index
    %c0_1 = arith.constant 0 : index
    %c0_2 = arith.constant 0 : index
    %0 = vector.load %arg2[%c0, %c0_0, %c0_1, %c0_2] : memref<1x36x9x4xf32, #tpu.memory_space<vmem>>, vector<1x8x8x4xf32>
    %1 = vector.shape_cast %0 : vector<1x8x8x4xf32> to vector<64x4xf32>
    %c0_3 = arith.constant 0 : index
    %c9 = arith.constant 9 : index
    %c0_4 = arith.constant 0 : index
    %c0_5 = arith.constant 0 : index
    %2 = vector.load %arg2[%c0_3, %c9, %c0_4, %c0_5] : memref<1x36x9x4xf32, #tpu.memory_space<vmem>>, vector<1x8x8x4xf32>
    %3 = vector.shape_cast %2 : vector<1x8x8x4xf32> to vector<64x4xf32>
    %c0_6 = arith.constant 0 : index
    %c0_7 = arith.constant 0 : index
    %c1 = arith.constant 1 : index
    %c0_8 = arith.constant 0 : index
    %4 = vector.load %arg2[%c0_6, %c0_7, %c1, %c0_8] : memref<1x36x9x4xf32, #tpu.memory_space<vmem>>, vector<1x8x8x4xf32>
    %5 = vector.shape_cast %4 : vector<1x8x8x4xf32> to vector<64x4xf32>
    %c0_9 = arith.constant 0 : index
    %c18 = arith.constant 18 : index
    %c0_10 = arith.constant 0 : index
    %c0_11 = arith.constant 0 : index
    %6 = vector.load %arg2[%c0_9, %c18, %c0_10, %c0_11] : memref<1x36x9x4xf32, #tpu.memory_space<vmem>>, vector<1x8x8x4xf32>
    %7 = vector.shape_cast %6 : vector<1x8x8x4xf32> to vector<64x4xf32>
    %c0_12 = arith.constant 0 : index
    %c27 = arith.constant 27 : index
    %c0_13 = arith.constant 0 : index
    %c0_14 = arith.constant 0 : index
    %8 = vector.load %arg2[%c0_12, %c27, %c0_13, %c0_14] : memref<1x36x9x4xf32, #tpu.memory_space<vmem>>, vector<1x8x8x4xf32>
    %9 = vector.shape_cast %8 : vector<1x8x8x4xf32> to vector<64x4xf32>
    %c0_15 = arith.constant 0 : index
    %c18_16 = arith.constant 18 : index
    %c1_17 = arith.constant 1 : index
    %c0_18 = arith.constant 0 : index
    %10 = vector.load %arg2[%c0_15, %c18_16, %c1_17, %c0_18] : memref<1x36x9x4xf32, #tpu.memory_space<vmem>>, vector<1x8x8x4xf32>
    %11 = vector.shape_cast %10 : vector<1x8x8x4xf32> to vector<64x4xf32>
    %c0_19 = arith.constant 0 : index
    %c1_20 = arith.constant 1 : index
    %c0_21 = arith.constant 0 : index
    %c0_22 = arith.constant 0 : index
    %12 = vector.load %arg2[%c0_19, %c1_20, %c0_21, %c0_22] : memref<1x36x9x4xf32, #tpu.memory_space<vmem>>, vector<1x8x8x4xf32>
    %13 = vector.shape_cast %12 : vector<1x8x8x4xf32> to vector<64x4xf32>
    %c0_23 = arith.constant 0 : index
    %c10 = arith.constant 10 : index
    %c0_24 = arith.constant 0 : index
    %c0_25 = arith.constant 0 : index
    %14 = vector.load %arg2[%c0_23, %c10, %c0_24, %c0_25] : memref<1x36x9x4xf32, #tpu.memory_space<vmem>>, vector<1x8x8x4xf32>
    %15 = vector.shape_cast %14 : vector<1x8x8x4xf32> to vector<64x4xf32>
    %c0_26 = arith.constant 0 : index
    %c1_27 = arith.constant 1 : index
    %c1_28 = arith.constant 1 : index
    %c0_29 = arith.constant 0 : index
    %16 = vector.load %arg2[%c0_26, %c1_27, %c1_28, %c0_29] : memref<1x36x9x4xf32, #tpu.memory_space<vmem>>, vector<1x8x8x4xf32>
    %17 = vector.shape_cast %16 : vector<1x8x8x4xf32> to vector<64x4xf32>
    %18 = tpu.concatenate %1, %3, %5, %7, %9, %11, %13, %15, %17 in 1 : vector<64x4xf32>, vector<64x4xf32>, vector<64x4xf32>, vector<64x4xf32>, vector<64x4xf32>, vector<64x4xf32>, vector<64x4xf32>, vector<64x4xf32>, vector<64x4xf32> -> vector<64x36xf32>
    %c0_30 = arith.constant 0 : index
    %c0_31 = arith.constant 0 : index
    %19 = vector.load %arg3[%c0_30, %c0_31] : memref<36x8xf32, #tpu.memory_space<vmem>>, vector<36x8xf32>
    %cst = arith.constant dense<0.000000e+00> : vector<64x8xf32>
    %20 = tpu.matmul %18, %19, %cst {dimension_numbers = #tpu.dot_dimension_numbers<[1], [0], [0], [1], [0, 0, 1, 1], [], []>} : vector<64x36xf32>, vector<36x8xf32>, vector<64x8xf32> -> vector<64x8xf32>
    %c0_32 = arith.constant 0 : index
    %c0_33 = arith.constant 0 : index
    %21 = vector.load %arg4[%c0_32, %c0_33] : memref<1x8xf32, #tpu.memory_space<vmem>>, vector<1x8xf32>
    %22 = vector.broadcast %21 : vector<1x8xf32> to vector<64x8xf32>
    %23 = arith.mulf %20, %22 : vector<64x8xf32>
    %c0_34 = arith.constant 0 : index
    %c0_35 = arith.constant 0 : index
    %24 = vector.load %arg5[%c0_34, %c0_35] : memref<1x8xf32, #tpu.memory_space<vmem>>, vector<1x8xf32>
    %25 = vector.broadcast %24 : vector<1x8xf32> to vector<64x8xf32>
    %26 = arith.addf %23, %25 : vector<64x8xf32>
    %cst_36 = arith.constant 0.000000e+00 : f32
    %27 = vector.broadcast %cst_36 : f32 to vector<64x8xf32>
    %28 = arith.maximumf %26, %27 : vector<64x8xf32>
    %cst_37 = arith.constant 0.000000e+00 : f32
    %29 = vector.broadcast %cst_37 : f32 to vector<1x10x10x8xf32>
    %c0_38 = arith.constant 0 : index
    %c0_39 = arith.constant 0 : index
    %c0_40 = arith.constant 0 : index
    %c0_41 = arith.constant 0 : index
    %30 = vector.load %arg6[%c0_38, %c0_39, %c0_40, %c0_41] : memref<1x10x10x8xf32, #tpu.memory_space<vmem>>, vector<1x10x10x8xf32>
    tpu.vector_store %arg6[%c0_38, %c0_39, %c0_40, %c0_41], %29 {strides = array<i32>} : memref<1x10x10x8xf32, #tpu.memory_space<vmem>>, vector<1x10x10x8xf32>,
    %31 = vector.shape_cast %28 : vector<64x8xf32> to vector<1x8x8x8xf32>
    %c0_42 = arith.constant 0 : index
    %c1_43 = arith.constant 1 : index
    %c1_44 = arith.constant 1 : index
    %c0_45 = arith.constant 0 : index
    %32 = vector.load %arg6[%c0_42, %c1_43, %c1_44, %c0_45] : memref<1x10x10x8xf32, #tpu.memory_space<vmem>>, vector<1x8x8x8xf32>
    tpu.vector_store %arg6[%c0_42, %c1_43, %c1_44, %c0_45], %31 {strides = array<i32>} : memref<1x10x10x8xf32, #tpu.memory_space<vmem>>, vector<1x8x8x8xf32>,
    return
  }
  func.func @transform_0(%arg0: i32, %arg1: i32) -> (i32, i32, i32, i32) {
    %c0_i32 = arith.constant 0 : i32
    %c0_i32_0 = arith.constant 0 : i32
    %c0_i32_1 = arith.constant 0 : i32
    %c0_i32_2 = arith.constant 0 : i32
    return %arg0, %c0_i32, %c0_i32_0, %c0_i32_1 : i32, i32, i32, i32
  }
  func.func @transform_1(%arg0: i32, %arg1: i32) -> (i32, i32) {
    %c0_i32 = arith.constant 0 : i32
    %c0_i32_0 = arith.constant 0 : i32
    return %c0_i32, %arg1 : i32, i32
  }
  func.func @transform_2(%arg0: i32, %arg1: i32) -> (i32, i32) {
    %c0_i32 = arith.constant 0 : i32
    %c0_i32_0 = arith.constant 0 : i32
    return %c0_i32, %arg1 : i32, i32
  }
  func.func @transform_3(%arg0: i32, %arg1: i32) -> (i32, i32) {
    %c0_i32 = arith.constant 0 : i32
    %c0_i32_0 = arith.constant 0 : i32
    return %c0_i32, %arg1 : i32, i32
  }
  func.func @transform_4(%arg0: i32, %arg1: i32) -> (i32, i32, i32, i32) {
    %c0_i32 = arith.constant 0 : i32
    %c0_i32_0 = arith.constant 0 : i32
    %c0_i32_1 = arith.constant 0 : i32
    return %arg0, %c0_i32, %c0_i32_0, %arg1 : i32, i32, i32, i32
  }
}

</mosaic_0001>

<bundles_post_ra>
// kernel: basic_block_forward.2
= control target key start
LH: loop header
LB: loop body
LE: loop exit
PB: predicated region body
PF: predicated region fallthrough
CT: control target
= control target key end

     0   :  { %s1117_s15 = smov 0   ;;  %s1119_s16 = smov 0   ;;  %s1499_s0 = inlined_call_operand.vmem [shape: f32[2,36,9,4], index: 0, kind: input, shape index: {}]   ;;  %s1500_s1 = inlined_call_operand.vmem [shape: f32[36,8], index: 1, kind: input, shape index: {}]   ;;  %s1501_s2 = inlined_call_operand.vmem [shape: f32[1,8], index: 2, kind: input, shape index: {}]   ;;  %s1502_s3 = inlined_call_operand.vmem [shape: f32[1,8], index: 3, kind: input, shape index: {}]   ;;  %s1503_s4 = inlined_call_operand.vmem [shape: f32[2,10,10,8], index: 4, kind: output, shape index: {}]  }
   0x1   :  { %s1121_s17 = smov 0  }
   0x2 LB: > { %s26_s18 = sadd.s32 1, %s1077_s16  ;;  %p929_p0 = scmp.ge.s32.totalorder %s1081_s17, 1  ;;  %s1081_s17 = sphi %s1121_s17, %s14_s17   ;;  %s1077_s16 = sphi %s1119_s16, %s1505_s16   ;;  %s1073_s15 = sphi %s1117_s15, %s1504_s15  }
   0x3   : > { %p28_p1 = scmp.ge.s32.totalorder %s26_s18, 2  ;;  %p201_p2 = scmp.lt.s32.totalorder %s1081_s17, 3 }
   0x5   : > { %s1507_s18 = smov (%p28_p1, %s26_s18), 0  ;;  %p202_p3 = pnand %p929_p0, %p201_p2 }
   0x6   : > { %p240_p4 = scmp.lt.s32.totalorder (!%p202_p3), %s1073_s15, 1  ;;  %s1083_s23 = smov (!%p202_p3), 8  }
   0x7   : > { %205 = sbr.rel (%p202_p3) target bundleno = 434 (0x1b2), region = 36  ;;  %s1084_s24 = smov (!%p202_p3), 4  }
   0x8   : > { %s1085_s25 = smov (!%p202_p3), 12   ;;  %s1086_s26 = smov (!%p202_p3), 16  }
   0x9   : > { %s1087_s27 = smov (!%p202_p3), 20   ;;  %s1088_s28 = smov (!%p202_p3), 24  }
   0xa   : > { %s1089_s29 = smov (!%p202_p3), 28   ;;  %s1090_s30 = smov (!%p202_p3), 32  }
   0xc   : > { %s1509_s15 = smov (!%p240_p4, %s1073_s15), 1  ;;  %v672_v49 = vld [vmem:[%s1500_s1 + $0x20] sm:$0xf]  ;;  %vm698_vm0 = vcmask 1043456   ;;  %v671_v51 = vld [vmem:[%s1500_s1 + $0x18] sm:$0xff]  ;;  %v670_v52 = vld [vmem:[%s1500_s1 + $0x10] sm:$0xff] }
   0xd   : > { %s1022_s19 = smul.u32 576, %s1509_s15  ;;  %1008 = vmatpush.msk.msra.mxu2 %vm698_vm0, %v672_v49  ;;  %1009 = vmatpush.msk.msra.mxu3 %vm698_vm0, %v672_v49  ;;  %v669_v53 = vld [vmem:[%s1500_s1 + $0x8] sm:$0xff]  ;;  %v668_v56 = vld [vmem:[%s1500_s1] sm:$0xff]  ;;  %vm596_vm1 = vcmask 31744   ;;  %vm605_vm2 = vcmask 64512   ;;  %vm614_vm3 = vcmask 97280  }
   0xe   : > { %988 = vmatpush.msk.msra.mxu0 %vm698_vm0, %v672_v49  ;;  %1007 = vmatpush.msk.msra.mxu1 %vm698_vm0, %v672_v49  ;;  %vm623_vm4 = vcmask 130048   ;;  %vm632_vm5 = vcmask 162816   ;;  %vm641_vm6 = vcmask 195584   ;;  %vm650_vm7 = vcmask 228352  }
   0xf   : > { %s1141_s22 = scalar_lea.vmem %s1499_s0, %s1022_s19  ;;  %1011 = vmatpush.msra.mxu2 %v671_v51  ;;  %1012 = vmatpush.msra.mxu3 %v671_v51  ;;  %vm659_vm8 = vcmask 261120   ;;  %vm673_vm9 = vcmask 293888   ;;  %s1023_s19 = smul.u32 160, %s1509_s15  ;;  %vm776_vm10 = vcmask 58368  }
  0x10   : > { %v1144_v0 = vld [vmem:[%s1141_s22 + $0x41] sm:$0xff]  ;;  %v1147_v1 = vld [vmem:[%s1141_s22 + $0xd0] sm:$0xff]  ;;  %714 = vmatpush.msra.mxu0 %v671_v51  ;;  %1010 = vmatpush.msra.mxu1 %v671_v51 }
  0x11   : > { %v944_v2 = vld [vmem:[%s1141_s22 + $0x160] sm:$0xff]  ;;  %388 = vrot.lane.b32.xlu1 %v1144_v0, %s1083_s23  ;;  %356 = vrot.lane.b32.xlu0 %v1147_v1, %s1084_s24  ;;  %v1159_v4 = vld [vmem:[%s1141_s22 + $0xf0] sm:$0xff] }
  0x12   : > { %420 = vrot.lane.b32.xlu2 %v944_v2, %s1085_s25  ;;  %v1156_v3 = vld [vmem:[%s1141_s22 + $0x61] sm:$0xff]  ;;  %v954_v6 = vld [vmem:[%s1141_s22 + $0x210] sm:$0xff]  ;;  %1014 = vmatpush.msra.mxu2 %v670_v52 }
  0x13   : > { %v946_v5 = vld [vmem:[%s1141_s22 + $0x180] sm:$0xff]  ;;  %v952_v7 = vld [vmem:[%s1141_s22 + $0x1f0] sm:$0xff]  ;;  %1015 = vmatpush.msra.mxu3 %v670_v52  ;;  %715 = vmatpush.msra.mxu0 %v670_v52 }
  0x14   : > { %v960_v8 = vld [vmem:[%s1141_s22 + $0x161] sm:$0xff]  ;;  %v1174_v9 = vld [vmem:[%s1141_s22 + $0x50] sm:$0xff]  ;;  %1017 = vmatpush.msra.mxu2 %v669_v53  ;;  %1013 = vmatpush.msra.mxu1 %v670_v52 }
  0x15   : > { %v962_v10 = vld [vmem:[%s1141_s22 + $0x181] sm:$0xff]  ;;  %v1178_v11 = vld [vmem:[%s1141_s22 + $0x70] sm:$0xff]  ;;  %1018 = vmatpush.msra.mxu3 %v669_v53  ;;  %716 = vmatpush.msra.mxu0 %v669_v53 }
  0x16   : > { %v1186_v12 = vld [vmem:[%s1141_s22 + $0xb0] sm:$0xff]  ;;  %v976_v14 = vld [vmem:[%s1141_s22 + $0xe0] sm:$0xff]  ;;  %1020 = vmatpush.msra.mxu2 %v668_v56  ;;  %1016 = vmatpush.msra.mxu1 %v669_v53 }
  0x17   : > { %v932_v13 = vld [vmem:[%s1141_s22 + $0x90] sm:$0xff]  ;;  %v280_v15 = vld [vmem:[%s1141_s22 + $0x1] sm:$0xff]  ;;  %1021 = vmatpush.msra.mxu3 %v668_v56  ;;  %717 = vmatpush.msra.mxu0 %v668_v56 }
  0x18   : > { %v978_v16 = vld [vmem:[%s1141_s22 + $0x100] sm:$0xff]  ;;  %v986_v18 = vld [vmem:[%s1141_s22 + $0x71] sm:$0xff]  ;;  %1019 = vmatpush.msra.mxu1 %v668_v56 }
  0x19   : > { %392 = vrot.lane.b32.xlu1 %v1156_v3, %s1083_s23  ;;  %360 = vrot.lane.b32.xlu0 %v1159_v4, %s1084_s24  ;;  %v1197_v17 = vld [vmem:[%s1141_s22 + $0x21] sm:$0xff]  ;;  %v984_v19 = vld [vmem:[%s1141_s22 + $0x51] sm:$0xff] }
  0x1a   : > { %424 = vrot.lane.b32.xlu2 %v946_v5, %s1085_s25  ;;  %v940_v20 = vld [vmem:[%s1141_s22 + $0x120] sm:$0xff]  ;;  %v948_v22 = vld [vmem:[%s1141_s22 + $0x1b0] sm:$0xff] }
  0x1b   : > { %v942_v21 = vld [vmem:[%s1141_s22 + $0x140] sm:$0xff]  ;;  %v945_v23 = vld [vmem:[%s1141_s22 + $0x170] sm:$0xff] }
  0x1c   : > { %v950_v24 = vld [vmem:[%s1141_s22 + $0x1d0] sm:$0xff]  ;;  %v958_v26 = vld [vmem:[%s1141_s22 + $0x141] sm:$0xff] }
  0x1d   : > { %v947_v25 = vld [vmem:[%s1141_s22 + $0x190] sm:$0xff]  ;;  %v956_v27 = vld [vmem:[%s1141_s22 + $0x121] sm:$0xff] }
  0x1e   : > { %v953_v28 = vld [vmem:[%s1141_s22 + $0x200] sm:$0xff]  ;;  %v1230_v29 = vld [vmem:[%s1141_s22 + $0x10] sm:$0xff] }
  0x1f   : > { %v955_v30 = vld [vmem:[%s1141_s22 + $0x220] sm:$0xff]  ;;  %v1234_v31 = vld [vmem:[%s1141_s22 + $0x30] sm:$0xff] }
  0x20   : > { %v963_v33 = vld [vmem:[%s1141_s22 + $0x191] sm:$0xff]  ;;  %v972_v35 = vld [vmem:[%s1141_s22 + $0xa0] sm:$0xff] }
  0x21   : > { %456 = vrot.lane.b32.xlu1 %v954_v6, %s1086_s26  ;;  %452 = vrot.lane.b32.xlu0 %v952_v7, %s1086_s26  ;;  %v961_v34 = vld [vmem:[%s1141_s22 + $0x171] sm:$0xff]  ;;  %v1252_v37 = vld [vmem:[%s1141_s22 + $0x60] sm:$0xff] }
  0x22   : > { %484 = vrot.lane.b32.xlu2 %v960_v8, %s1087_s27  ;;  %v974_v38 = vld [vmem:[%s1141_s22 + $0xc0] sm:$0xff]  ;;  %v982_v41 = vld [vmem:[%s1141_s22 + $0x31] sm:$0xff] }
  0x23   : > { %v971_v39 = vld [vmem:[%s1141_s22 + $0x80] sm:$0xff]  ;;  %v980_v42 = vld [vmem:[%s1141_s22 + $0x11] sm:$0xff] }
  0x24   : > { %v979_v46 = vld [vmem:[%s1141_s22 + $0x110] sm:$0xff]  ;;  %v987_v59 = vld [vmem:[%s1141_s22 + $0x81] sm:$0xff] }
  0x25   : > { %v941_v58 = vld [vmem:[%s1141_s22 + $0x130] sm:$0xff]  ;;  %v951_v2 = vld [vmem:[%s1141_s22 + $0x1e0] sm:$0xff] }
  0x26   : > { %v943_v60 = vld [vmem:[%s1141_s22 + $0x150] sm:$0xff]  ;;  %v267_v5 = vld [vmem:[%s1141_s22 + $0x40] sm:$0xff] }
  0x27   : > { %v265_v7 = vld [vmem:[%s1141_s22 + $0x20] sm:$0xff] }
  0x29   : > { %516 = vrot.lane.b32.xlu1 %v1174_v9, %s1088_s28  ;;  %488 = vrot.lane.b32.xlu0 %v962_v10, %s1087_s27 }
  0x2a   : > { %520 = vrot.lane.b32.xlu2 %v1178_v11, %s1088_s28 }
  0x31   : > { %352 = vrot.lane.b32.xlu1 %v1186_v12, %s1084_s24  ;;  %348 = vrot.lane.b32.xlu0 %v932_v13, %s1084_s24 }
  0x32   : > { %548 = vrot.lane.b32.xlu2 %v976_v14, %s1089_s29 }
  0x39   : > { %380 = vrot.lane.b32.xlu1 %v280_v15, %s1083_s23  ;;  %552 = vrot.lane.b32.xlu0 %v978_v16, %s1089_s29 }
  0x3a   : > { %384 = vrot.lane.b32.xlu2 %v1197_v17, %s1083_s23 }
  0x41   : > { %584 = vrot.lane.b32.xlu1 %v986_v18, %s1090_s30  ;;  %580 = vrot.lane.b32.xlu0 %v984_v19, %s1090_s30 }
  0x42   : > { %358 = vrot.lane.b32.xlu2 %v976_v14, %s1084_s24 }
  0x49   : > { %412 = vrot.lane.b32.xlu1 %v940_v20, %s1085_s25  ;;  %362 = vrot.lane.b32.xlu0 %v978_v16, %s1084_s24  ;;  %v959_v16 = vld [vmem:[%s1141_s22 + $0x151] sm:$0xff]  ;;  %v263_v20 = vld [vmem:[%s1141_s22] sm:$0xff] }
  0x4a   : > { %416 = vrot.lane.b32.xlu2 %v942_v21, %s1085_s25 }
  0x51   : > { %394 = vrot.lane.b32.xlu1 %v986_v18, %s1083_s23  ;;  %390 = vrot.lane.b32.xlu0 %v984_v19, %s1083_s23 }
  0x52   : > { %444 = vrot.lane.b32.xlu2 %v948_v22, %s1086_s26 }
  0x59   : > { %422 = vrot.lane.b32.xlu1 %v945_v23, %s1085_s25  ;;  %448 = vrot.lane.b32.xlu0 %v950_v24, %s1086_s26 }
  0x5a   : > { %426 = vrot.lane.b32.xlu2 %v947_v25, %s1085_s25 }
  0x61   : > { %480 = vrot.lane.b32.xlu1 %v958_v26, %s1087_s27  ;;  %476 = vrot.lane.b32.xlu0 %v956_v27, %s1087_s27 }
  0x62   : > { %454 = vrot.lane.b32.xlu2 %v953_v28, %s1086_s26 }
  0x69   : > { %508 = vrot.lane.b32.xlu1 %v1230_v29, %s1088_s28  ;;  %458 = vrot.lane.b32.xlu0 %v955_v30, %s1086_s26 }
  0x6a   : > { %512 = vrot.lane.b32.xlu2 %v1234_v31, %s1088_s28 }
  0x6c   : > { %v1241_v32 = vpop.permute.xlu2 %420 }
  0x71   : > { %490 = vrot.lane.b32.xlu1 %v963_v33, %s1087_s27  ;;  %486 = vrot.lane.b32.xlu0 %v961_v34, %s1087_s27 }
  0x72   : > { %540 = vrot.lane.b32.xlu2 %v972_v35, %s1089_s29 }
  0x74   : > { %v1249_v36 = vpop.permute.xlu2 %424 }
  0x79   : > { %518 = vrot.lane.b32.xlu1 %v1252_v37, %s1088_s28  ;;  %544 = vrot.lane.b32.xlu0 %v974_v38, %s1089_s29 }
  0x7a   : > { %522 = vrot.lane.b32.xlu2 %v971_v39, %s1088_s28 }
  0x7c   : > { %v1260_v40 = vpop.permute.xlu2 %484 }
  0x81   : > { %576 = vrot.lane.b32.xlu1 %v982_v41, %s1090_s30  ;;  %572 = vrot.lane.b32.xlu0 %v980_v42, %s1090_s30 }
  0x82   : > { %350 = vrot.lane.b32.xlu2 %v972_v35, %s1084_s24 }
  0x83   : > { %v1267_v43 = vpop.permute.xlu1 %388  ;;  %v1269_v44 = vpop.permute.xlu0 %356 }
  0x84   : > { %v1271_v45 = vpop.permute.xlu2 %520  ;;  %v601_v14 = vsel %vm596_vm1, %v267_v5, %v1269_v44 }
  0x85   : > { %v610_v19 = vsel %vm605_vm2, %v601_v14, %v1267_v43 }
  0x86   : > { %v619_v22 = vsel %vm614_vm3, %v610_v19, %v1241_v32 }
  0x89   : > { %550 = vrot.lane.b32.xlu1 %v1159_v4, %s1089_s29  ;;  %354 = vrot.lane.b32.xlu0 %v974_v38, %s1084_s24  ;;  %v957_v4 = vld [vmem:[%s1141_s22 + $0x131] sm:$0xff] }
  0x8a   : > { %554 = vrot.lane.b32.xlu2 %v979_v46, %s1089_s29 }
  0x8b   : > { %v1278_v47 = vpop.permute.xlu1 %392  ;;  %v361_v48 = vpop.permute.xlu0 %360 }
  0x8c   : > { %v1283_v50 = vpop.permute.xlu2 %548  ;;  %v603_v18 = vsel %vm596_vm1, %v1252_v37, %v361_v48 }
  0x8d   : > { %v612_v21 = vsel %vm605_vm2, %v603_v18, %v1278_v47 }
  0x8e   : > { %v621_v30 = vsel %vm614_vm3, %v612_v21, %v1249_v36 }
  0x91   : > { %386 = vrot.lane.b32.xlu1 %v982_v41, %s1083_s23  ;;  %382 = vrot.lane.b32.xlu0 %v980_v42, %s1083_s23 }
  0x92   : > { %582 = vrot.lane.b32.xlu2 %v1156_v3, %s1090_s30  ;;  %v949_v3 = vld [vmem:[%s1141_s22 + $0x1c0] sm:$0xff]  ;;  %s1409_s22 = scalar_lea.vmem %s1503_s4, %s1023_s19 }
  0x93   : > { %v457_v54 = vpop.permute.xlu1 %456  ;;  %v453_v55 = vpop.permute.xlu0 %452 }
  0x94   : > { %v385_v57 = vpop.permute.xlu2 %384  ;;  %v628_v26 = vsel %vm623_vm4, %v619_v22, %v453_v55  ;;  %v630_v33 = vsel %vm623_vm4, %v621_v30, %v457_v54 }
  0x95   : > { %v637_v34 = vsel %vm632_vm5, %v628_v26, %v1260_v40 }
  0x99   : > { %414 = vrot.lane.b32.xlu1 %v941_v58, %s1085_s25  ;;  %586 = vrot.lane.b32.xlu0 %v987_v59, %s1090_s30 }
  0x9a   : > { %418 = vrot.lane.b32.xlu2 %v943_v60, %s1085_s25 }
  0x9b   : > { %v517_v61 = vpop.permute.xlu1 %516  ;;  %v489_v62 = vpop.permute.xlu0 %488 }
  0x9c   : > { %v1307_v63 = vpop.permute.xlu2 %358  ;;  %v639_v32 = vsel %vm632_vm5, %v630_v33, %v489_v62  ;;  %v646_v35 = vsel %vm641_vm6, %v637_v34, %v517_v61 }
  0x9d   : > { %v648_v36 = vsel %vm641_vm6, %v639_v32, %v1271_v45  ;;  %v655_v40 = vsel %vm650_vm7, %v646_v35, %v1283_v50 }
  0xa1   : > { %450 = vrot.lane.b32.xlu1 %v951_v2, %s1086_s26  ;;  %446 = vrot.lane.b32.xlu0 %v949_v3, %s1086_s26 }
  0xa2   : > { %478 = vrot.lane.b32.xlu2 %v957_v4, %s1087_s27 }
  0xa3   : > { %v353_v6 = vpop.permute.xlu1 %352  ;;  %v349_v8 = vpop.permute.xlu0 %348 }
  0xa4   : > { %v599_v10 = vsel %vm596_vm1, %v265_v7, %v353_v6  ;;  %v1318_v13 = vpop.permute.xlu2 %416  ;;  %v597_v23 = vsel %vm596_vm1, %v263_v20, %v349_v8 }
  0xa5   : > { %v1323_v15 = vsel %vm605_vm2, %v599_v10, %v385_v57 }
  0xa6   : > { %v617_v62 = vsel %vm614_vm3, %v1323_v15, %v1318_v13  ;;  %v602_v13 = vsel %vm596_vm1, %v1174_v9, %v1307_v63 }
  0xa9   : > { %510 = vrot.lane.b32.xlu1 %v265_v7, %s1088_s28  ;;  %482 = vrot.lane.b32.xlu0 %v959_v16, %s1087_s27 }
  0xaa   : > { %514 = vrot.lane.b32.xlu2 %v267_v5, %s1088_s28 }
  0xab   : > { %v381_v24 = vpop.permute.xlu1 %380  ;;  %v553_v25 = vpop.permute.xlu0 %552 }
  0xac   : > { %v606_v27 = vsel %vm605_vm2, %v597_v23, %v381_v24  ;;  %v445_v28 = vpop.permute.xlu2 %444  ;;  %v657_v37 = vsel %vm650_vm7, %v648_v36, %v553_v25 }
  0xb1   : > { %546 = vrot.lane.b32.xlu1 %v1147_v1, %s1089_s29  ;;  %542 = vrot.lane.b32.xlu0 %v1186_v12, %s1089_s29 }
  0xb2   : > { %574 = vrot.lane.b32.xlu2 %v1197_v17, %s1090_s30 }
  0xb3   : > { %v585_v38 = vpop.permute.xlu1 %584  ;;  %v581_v39 = vpop.permute.xlu0 %580 }
  0xb4   : > { %v664_v1 = vsel %vm659_vm8, %v655_v40, %v581_v39  ;;  %v666_v41 = vsel %vm659_vm8, %v657_v37, %v585_v38  ;;  %v427_v12 = vpop.permute.xlu2 %426 }
  0xb5   : > { %993 = vmatmul.msk.f32.vlgmr.msra.gmra.mxu2 %vm673_vm9, %v664_v1  ;;  %995 = vmatmul.msk.f32.vlgmr.msra.gmra.mxu3 %vm673_vm9, %v666_v41 }
  0xb9   : > { %578 = vrot.lane.b32.xlu0 %v1144_v0, %s1090_s30 }
  0xbb   : > { %v413_v17 = vpop.permute.xlu1 %412  ;;  %v363_v42 = vpop.permute.xlu0 %362 }
  0xbc   : > { %v455_v43 = vpop.permute.xlu2 %454  ;;  %v604_v44 = vsel %vm596_vm1, %v1178_v11, %v363_v42  ;;  %v615_v11 = vsel %vm614_vm3, %v606_v27, %v413_v17 }
  0xbd   : > { %v624_v3 = vsel %vm623_vm4, %v615_v11, %v445_v28 }
  0xc3   : > { %v395_v45 = vpop.permute.xlu1 %394  ;;  %v391_v46 = vpop.permute.xlu0 %390 }
  0xc4   : > { %v613_v47 = vsel %vm605_vm2, %v604_v44, %v395_v45  ;;  %v513_v49 = vpop.permute.xlu2 %512  ;;  %v611_v20 = vsel %vm605_vm2, %v602_v13, %v391_v46  ;;  %v1091_v46 = vmov 0.0  }
  0xc5   : > { %v622_v48 = vsel %vm614_vm3, %v613_v47, %v427_v12  ;;  %775 = vst.msk [vmem:[%s1409_s22] sm:$0xff] %vm605_vm2, %v1091_v46 }
  0xc6   : > { %777 = vst.msk [vmem:[%s1409_s22 + $0x8] sm:$0x3] %vm776_vm10, %v1091_v46 }
  0xc7   : > { %786 = vst.msk [vmem:[%s1409_s22 + $0x50] sm:$0xff] %vm605_vm2, %v1091_v46 }
  0xc8   : > { %787 = vst.msk [vmem:[%s1409_s22 + $0x58] sm:$0x3] %vm776_vm10, %v1091_v46 }
  0xc9   : > { %794 = vst.msk [vmem:[%s1409_s22 + $0x90] sm:$0xff] %vm605_vm2, %v1091_v46 }
  0xca   : > { %795 = vst.msk [vmem:[%s1409_s22 + $0x98] sm:$0x3] %vm776_vm10, %v1091_v46 }
  0xcb   : > { %v423_v50 = vpop.permute.xlu1 %422  ;;  %v449_v51 = vpop.permute.xlu0 %448  ;;  %778 = vst.msk [vmem:[%s1409_s22 + $0x10] sm:$0xff] %vm605_vm2, %v1091_v46 }
  0xcc   : > { %v541_v54 = vpop.permute.xlu2 %540  ;;  %v626_v2 = vsel %vm623_vm4, %v617_v62, %v449_v51  ;;  %v620_v21 = vsel %vm614_vm3, %v611_v20, %v423_v50  ;;  %779 = vst.msk [vmem:[%s1409_s22 + $0x18] sm:$0x3] %vm776_vm10, %v1091_v46 }
  0xcd   : > { %v629_v22 = vsel %vm623_vm4, %v620_v21, %v455_v43  ;;  %780 = vst.msk [vmem:[%s1409_s22 + $0x20] sm:$0xff] %vm605_vm2, %v1091_v46 }
  0xce   : > { %781 = vst.msk [vmem:[%s1409_s22 + $0x28] sm:$0x3] %vm776_vm10, %v1091_v46 }
  0xcf   : > { %782 = vst.msk [vmem:[%s1409_s22 + $0x30] sm:$0xff] %vm605_vm2, %v1091_v46 }
  0xd0   : > { %783 = vst.msk [vmem:[%s1409_s22 + $0x38] sm:$0x3] %vm776_vm10, %v1091_v46 }
  0xd1   : > { %784 = vst.msk [vmem:[%s1409_s22 + $0x40] sm:$0xff] %vm605_vm2, %v1091_v46 }
  0xd2   : > { %785 = vst.msk [vmem:[%s1409_s22 + $0x48] sm:$0x3] %vm776_vm10, %v1091_v46 }
  0xd3   : > { %v481_v52 = vpop.permute.xlu1 %480  ;;  %v477_v53 = vpop.permute.xlu0 %476  ;;  %788 = vst.msk [vmem:[%s1409_s22 + $0x60] sm:$0xff] %vm605_vm2, %v1091_v46 }
  0xd4   : > { %v523_v56 = vpop.permute.xlu2 %522  ;;  %v635_v4 = vsel %vm632_vm5, %v626_v2, %v481_v52  ;;  %v633_v5 = vsel %vm632_vm5, %v624_v3, %v477_v53  ;;  %789 = vst.msk [vmem:[%s1409_s22 + $0x68] sm:$0x3] %vm776_vm10, %v1091_v46 }
  0xd5   : > { %v644_v8 = vsel %vm641_vm6, %v635_v4, %v513_v49  ;;  %790 = vst.msk [vmem:[%s1409_s22 + $0x70] sm:$0xff] %vm605_vm2, %v1091_v46 }
  0xd6   : > { %791 = vst.msk [vmem:[%s1409_s22 + $0x78] sm:$0x3] %vm776_vm10, %v1091_v46 }
  0xd7   : > { %792 = vst.msk [vmem:[%s1409_s22 + $0x80] sm:$0xff] %vm605_vm2, %v1091_v46 }
  0xd8   : > { %793 = vst.msk [vmem:[%s1409_s22 + $0x88] sm:$0x3] %vm776_vm10, %v1091_v46 }
  0xdb   : > { %v509_v55 = vpop.permute.xlu1 %508  ;;  %v459_v0 = vpop.permute.xlu0 %458 }
  0xdc   : > { %v351_v59 = vpop.permute.xlu2 %350  ;;  %v642_v6 = vsel %vm641_vm6, %v633_v5, %v509_v55  ;;  %v631_v33 = vsel %vm623_vm4, %v622_v48, %v459_v0 }
  0xdd   : > { %v651_v18 = vsel %vm650_vm7, %v642_v6, %v541_v54  ;;  %v598_v42 = vsel %vm596_vm1, %v1230_v29, %v351_v59 }
  0xe3   : > { %v491_v57 = vpop.permute.xlu1 %490  ;;  %v487_v58 = vpop.permute.xlu0 %486 }
  0xe4   : > { %v555_v7 = vpop.permute.xlu2 %554  ;;  %v638_v23 = vsel %vm632_vm5, %v629_v22, %v487_v58  ;;  %v640_v34 = vsel %vm632_vm5, %v631_v33, %v491_v57 }
  0xe5   : > { %v649_v35 = vsel %vm641_vm6, %v640_v34, %v523_v56 }
  0xe6   : > { %v658_v36 = vsel %vm650_vm7, %v649_v35, %v555_v7 }
  0xeb   : > { %v519_v60 = vpop.permute.xlu1 %518  ;;  %v545_v61 = vpop.permute.xlu0 %544 }
  0xec   : > { %v653_v10 = vsel %vm650_vm7, %v644_v8, %v545_v61  ;;  %v583_v24 = vpop.permute.xlu2 %582  ;;  %v647_v25 = vsel %vm641_vm6, %v638_v23, %v519_v60  ;;  %v1057_v60 = vld [vmem:[%s1501_s2] ss:$0 sm:$0xff] }
  0xed   : > { %v1058_v61 = vld [vmem:[%s1502_s3] ss:$0 sm:$0xff] }
  0xf3   : > { %v577_v14 = vpop.permute.xlu1 %576  ;;  %v573_v16 = vpop.permute.xlu0 %572 }
  0xf4   : > { %v660_v15 = vsel %vm659_vm8, %v651_v18, %v573_v16  ;;  %v662_v19 = vsel %vm659_vm8, %v653_v10, %v577_v14  ;;  %v419_v32 = vpop.permute.xlu2 %418 }
  0xf5   : > { %989 = vmatmul.msk.f32.vlgmr.msra.gmra.mxu0 %vm673_vm9, %v660_v15  ;;  %991 = vmatmul.msk.f32.vlgmr.msra.gmra.mxu1 %vm673_vm9, %v662_v19 }
  0xfb   : > { %v551_v9 = vpop.permute.xlu1 %550  ;;  %v355_v63 = vpop.permute.xlu0 %354 }
  0xfc   : > { %v656_v26 = vsel %vm650_vm7, %v647_v25, %v551_v9  ;;  %v479_v40 = vpop.permute.xlu2 %478  ;;  %v600_v47 = vsel %vm596_vm1, %v1234_v31, %v355_v63 }
  0xfd   : > { %v665_v27 = vsel %vm659_vm8, %v656_v26, %v583_v24 }
  0xfe   : > { %994 = vmatmul.msk.f32.gmra.mxu2 %vm673_vm9, %v665_v27 }
 0x103   : > { %v387_v28 = vpop.permute.xlu1 %386  ;;  %v383_v30 = vpop.permute.xlu0 %382 }
 0x104   : > { %v515_v12 = vpop.permute.xlu2 %514  ;;  %v607_v43 = vsel %vm605_vm2, %v598_v42, %v383_v30  ;;  %v609_v48 = vsel %vm605_vm2, %v600_v47, %v387_v28 }
 0x105   : > { %v618_v53 = vsel %vm614_vm3, %v609_v48, %v419_v32 }
 0x10b   : > { %v415_v37 = vpop.permute.xlu1 %414  ;;  %v587_v38 = vpop.permute.xlu0 %586 }
 0x10c   : > { %v667_v39 = vsel %vm659_vm8, %v658_v36, %v587_v38  ;;  %v616_v44 = vsel %vm614_vm3, %v607_v43, %v415_v37  ;;  %v575_v50 = vpop.permute.xlu2 %574 }
 0x10d   : > { %996 = vmatmul.msk.f32.gmra.mxu3 %vm673_vm9, %v667_v39 }
 0x113   : > { %v447_v1 = vpop.permute.xlu0 %446  ;;  %v451_v41 = vpop.permute.xlu1 %450 }
 0x114   : > { %v625_v29 = vsel %vm623_vm4, %v616_v44, %v447_v1  ;;  %v627_v55 = vsel %vm623_vm4, %v618_v53, %v451_v41 }
 0x115   : > { %v634_v49 = vsel %vm632_vm5, %v625_v29, %v479_v40 }
 0x11b   : > { %v483_v17 = vpop.permute.xlu0 %482  ;;  %v511_v45 = vpop.permute.xlu1 %510 }
 0x11c   : > { %v643_v51 = vsel %vm641_vm6, %v634_v49, %v511_v45  ;;  %v636_v0 = vsel %vm632_vm5, %v627_v55, %v483_v17 }
 0x11d   : > { %v645_v57 = vsel %vm641_vm6, %v636_v0, %v515_v12 }
 0x123   : > { %v543_v52 = vpop.permute.xlu0 %542  ;;  %v547_v56 = vpop.permute.xlu1 %546 }
 0x124   : > { %v652_v31 = vsel %vm650_vm7, %v643_v51, %v543_v52  ;;  %v654_v58 = vsel %vm650_vm7, %v645_v57, %v547_v56 }
 0x125   : > { %v661_v54 = vsel %vm659_vm8, %v652_v31, %v575_v50 }
 0x126   : > { %990 = vmatmul.msk.f32.gmra.mxu0 %vm673_vm9, %v661_v54 }
 0x12b   : > { %v579_v59 = vpop.permute.xlu0 %578 }
 0x12c   : > { %v663_v11 = vsel %vm659_vm8, %v654_v58, %v579_v59 }
 0x12d   : > { %992 = vmatmul.msk.f32.gmra.mxu1 %vm673_vm9, %v663_v11 }
 0x138   : > { %v731_v62 = vpop.f32.mrf.mxu2  ;;  %v737_v2 = vpop.f32.mrf.mxu3 }
 0x139   : > { %v751_v3 = vmul.f32 %v1057_v60, %v731_v62  ;;  %v753_v4 = vmul.f32 %v1057_v60, %v737_v2 }
 0x13b   : > { %v763_v5 = vadd.f32 %v1058_v61, %v751_v3  ;;  %v765_v6 = vadd.f32 %v1058_v61, %v753_v4 }
 0x13d   : > { %v771_v7 = vmax.f32 %v763_v5, 0.0  ;;  %v773_v8 = vmax.f32 %v765_v6, 0.0 }
 0x13f   : > { %1001 = vst.msk [vmem:[%s1409_s22 + $0x51] sm:$0xff] %vm605_vm2, %v771_v7 }
 0x140   : > { %1003 = vst.msk [vmem:[%s1409_s22 + $0x71] sm:$0xff] %vm605_vm2, %v773_v8 }
 0x172   : > { %v719_v10 = vpop.f32.mrf.mxu0  ;;  %v725_v14 = vpop.f32.mrf.mxu1 }
 0x173   : > { %v747_v16 = vmul.f32 %v1057_v60, %v719_v10  ;;  %v749_v18 = vmul.f32 %v1057_v60, %v725_v14 }
 0x175   : > { %v759_v13 = vadd.f32 %v1058_v61, %v747_v16  ;;  %v761_v15 = vadd.f32 %v1058_v61, %v749_v18 }
 0x177   : > { %v767_v19 = vmax.f32 %v759_v13, 0.0  ;;  %v769_v20 = vmax.f32 %v761_v15, 0.0 }
 0x179   : > { %997 = vst.msk [vmem:[%s1409_s22 + $0x11] sm:$0xff] %vm605_vm2, %v767_v19 }
 0x17a   : > { %999 = vst.msk [vmem:[%s1409_s22 + $0x31] sm:$0xff] %vm605_vm2, %v769_v20 }
 0x181   : > { %v734_v21 = vpop.f32.mrf.mxu2 }
 0x182   : > { %v752_v22 = vmul.f32 %v1057_v60, %v734_v21 }
 0x184   : > { %v764_v23 = vadd.f32 %v1058_v61, %v752_v22 }
 0x186   : > { %v772_v24 = vmax.f32 %v764_v23, 0.0 }
 0x188   : > { %1002 = vst.msk [vmem:[%s1409_s22 + $0x61] sm:$0xff] %vm605_vm2, %v772_v24 }
 0x190   : > { %v740_v25 = vpop.f32.mrf.mxu3 }
 0x191   : > { %v754_v9 = vmul.f32 %v1057_v60, %v740_v25 }
 0x193   : > { %v766_v63 = vadd.f32 %v1058_v61, %v754_v9 }
 0x195   : > { %v774_v26 = vmax.f32 %v766_v63, 0.0 }
 0x197   : > { %1004 = vst.msk [vmem:[%s1409_s22 + $0x81] sm:$0xff] %vm605_vm2, %v774_v26 }
 0x1a3   : > { %v722_v27 = vpop.f32.mrf.mxu0 }
 0x1a4   : > { %v748_v28 = vmul.f32 %v1057_v60, %v722_v27 }
 0x1a6   : > { %v760_v30 = vadd.f32 %v1058_v61, %v748_v28 }
 0x1a8   : > { %v768_v33 = vmax.f32 %v760_v30, 0.0 }
 0x1aa   : > { %998 = vst.msk [vmem:[%s1409_s22 + $0x21] sm:$0xff] %vm605_vm2, %v768_v33  ;;  %v728_v34 = vpop.f32.mrf.mxu1 }
 0x1ab   : > { %v750_v32 = vmul.f32 %v1057_v60, %v728_v34 }
 0x1ad   : > { %v762_v35 = vadd.f32 %v1058_v61, %v750_v32 }
 0x1af   : > { %v770_v36 = vmax.f32 %v762_v35, 0.0 }
 0x1b1   : > { %1000 = vst.msk [vmem:[%s1409_s22 + $0x41] sm:$0xff] %vm605_vm2, %v770_v36 }
 0x1b2 PF: > { %s14_s17 = sadd.s32 1, %s1081_s17   ;;  %s1504_s15 = smov %s1077_s16 }
 0x1b3   : > { %p11_p5 = scmp.ge.s32.totalorder %s14_s17, 4   ;;  %s1505_s16 = smov %s1507_s18 }
 0x1b5   :  { %13 = sbr.rel (!%p11_p5) target bundleno = 2 (0x2), region = 81 }

// kernel: basic_block_forward.3
= control target key start
LH: loop header
LB: loop body
LE: loop exit
PB: predicated region body
PF: predicated region fallthrough
CT: control target
= control target key end

     0   :  { %8 = vsyncpa [#allocation3], 0  ;;  %s1636_s0 = inlined_call_operand.vmem [shape: f32[2,10,10,8], index: 0, kind: input, shape index: {}]   ;;  %s1637_s1 = inlined_call_operand.vmem [shape: f32[2,36,9,4], index: 1, kind: input, shape index: {}]   ;;  %s1638_s2 = inlined_call_operand.vmem [shape: f32[76,8], index: 2, kind: input, shape index: {}]   ;;  %s1639_s3 = inlined_call_operand.hbm [shape: f32[2,8,8,8], index: 3, kind: output, shape index: {}]  }
   0x1   :  { %10 = vsyncpa [#allocation3 + $0x1], 0  ;;  %s1170_s12 = smov 0   ;;  %s1172_s13 = smov 0  }
   0x2   :  { %s1174_s14 = smov 0   ;;  %s1176_s15 = smov 0  }
   0x3   :  { %s1178_s16 = smov 0   ;;  %s1180_s17 = smov 0  }
   0x4 LB: > { %s884_s18 = sadd.s32 4294967295, %s1138_s17   ;;  %s885_s19 = sadd.s32 4294967294, %s1138_s17   ;;  %s1138_s17 = sphi %s1180_s17, %s16_s17   ;;  %s1134_s16 = sphi %s1178_s16, %s1646_s16   ;;  %s1130_s15 = sphi %s1176_s15, %s1645_s15   ;;  %s1126_s14 = sphi %s1174_s14, %s1644_s14   ;;  %s1122_s13 = sphi %s1172_s13, %s1643_s13   ;;  %s1118_s12 = sphi %s1170_s12, %s1642_s12  }
   0x5   : > { %s28_s20 = sadd.s32 1, %s1134_s16  ;;  %s115_s21 = sadd.s32 1, %s1126_s14 }
   0x6   : > { %p30_p0 = scmp.ge.s32.totalorder %s28_s20, 2  ;;  %p125_p1 = scmp.ne.s32.totalorder %s1126_s14, %s1122_s13 }
   0x7   : > { %p126_p2 = scmp.eq.s32.totalorder %s884_s18, 1  ;;  %p131_p3 = scmp.ne.s32.totalorder %s1122_s13, %s1118_s12 }
   0x8   : > { %s1648_s20 = smov (%p30_p0, %s28_s20), 0  ;;  %p132_p5 = scmp.eq.s32.totalorder %s885_s19, 1 }
   0x9   : > { %p1210_p4 = por %p126_p2, %p125_p1  ;;  %s110_s23 = ssub.s32 %s1134_s16, %s1648_s20 }
   0xa   : > { %p889_p6 = scmp.ge.s32.totalorder %s1138_s17, 1  ;;  %p113_p7 = scmp.eq.s32.totalorder %s110_s23, 0 }
   0xb   : > { %p1217_p8 = por %p132_p5, %p131_p3  ;;  %p174_p9 = scmp.lt.s32.totalorder %s1138_s17, 3 }
   0xc   : > { %s1223_s25 = scalar_select %p113_p7, %s1126_s14, %s115_s21  }
   0xd   : > { %p175_p10 = pnand %p889_p6, %p174_p9 }
   0xe   : > { %p208_p11 = scmp.lt.s32.totalorder (!%p175_p10), %s1130_s15, 1  ;;  %s1140_s4 = smov (!%p175_p10), 8  }
   0xf   : > { %178 = sbr.rel (%p175_p10) target bundleno = 459 (0x1cb), region = 32  ;;  %s1141_s5 = smov (!%p175_p10), 16  }
  0x10   : > { %s1142_s6 = smov (!%p175_p10), 32   ;;  %s1143_s7 = smov (!%p175_p10), 24  }
  0x11   : > { %s1144_s8 = smov (!%p175_p10), 40   ;;  %s1145_s9 = smov (!%p175_p10), 56  }
  0x12   : > { %s1146_s10 = smov (!%p175_p10), 48   ;;  %s1147_s11 = smov (!%p175_p10), 64  }
  0x13   : > { %s1080_s28 = scalar_lea.hbm (!%p175_p10), %s1639_s3, 128 }
  0x14   : > { %s1227_s26 = scalar_select %p208_p11, %s1130_s15, 1  ;;  %vm593_vm0 = vcmask 64512   ;;  %vm602_vm1 = vcmask 130048   ;;  %v683_v50 = vld [vmem:[%s1638_s2 + $0x48] sm:$0xf]  ;;  %vm709_vm2 = vcmask 1043456  }
  0x15   : > { %965 = vmatpush.msk.msra.mxu2 %vm709_vm2, %v683_v50  ;;  %966 = vmatpush.msk.msra.mxu3 %vm709_vm2, %v683_v50  ;;  %v682_v54 = vld [vmem:[%s1638_s2 + $0x40] sm:$0xff]  ;;  %v681_v56 = vld [vmem:[%s1638_s2 + $0x38] sm:$0xff]  ;;  %v680_v58 = vld [vmem:[%s1638_s2 + $0x30] sm:$0xff]  ;;  %vm611_vm3 = vcmask 195584   ;;  %vm620_vm4 = vcmask 261120   ;;  %vm629_vm5 = vcmask 326656  }
  0x16   : > { %s994_s27 = smul.u32 160, %s1227_s26  ;;  %949 = vmatpush.msk.msra.mxu0 %vm709_vm2, %v683_v50  ;;  %964 = vmatpush.msk.msra.mxu1 %vm709_vm2, %v683_v50  ;;  %v679_v59 = vld [vmem:[%s1638_s2 + $0x28] sm:$0xff]  ;;  %v678_v63 = vld [vmem:[%s1638_s2 + $0x20] sm:$0xff]  ;;  %vm638_vm6 = vcmask 392192   ;;  %vm647_vm7 = vcmask 457728   ;;  %vm656_vm8 = vcmask 523264  }
  0x17   : > { %s892_s18 = smul.u32 576, %s1227_s26  ;;  %s1148_s26 = smov 72   ;;  %968 = vmatpush.msra.mxu2 %v682_v54  ;;  %969 = vmatpush.msra.mxu3 %v682_v54  ;;  %vm665_vm9 = vcmask 588800   ;;  %vm684_vm10 = vcmask 621568  }
  0x18   : > { %s1233_s30 = scalar_lea.vmem %s1636_s0, %s994_s27  ;;  %720 = vmatpush.msra.mxu0 %v682_v54  ;;  %967 = vmatpush.msra.mxu1 %v682_v54 }
  0x19   : > { %v1236_v0 = vld [vmem:[%s1233_s30 + $0x41] sm:$0xff]  ;;  %v1248_v3 = vld [vmem:[%s1233_s30 + $0x51] sm:$0xff]  ;;  %s1330_s23 = scalar_lea.vmem %s1637_s1, %s892_s18  ;;  %971 = vmatpush.msra.mxu2 %v681_v56  ;;  %972 = vmatpush.msra.mxu3 %v681_v56 }
  0x1a   : > { %v1239_v1 = vld [vmem:[%s1233_s30 + $0x21] sm:$0xff]  ;;  %321 = vrot.lane.b32.xlu2 %v1236_v0, %s1140_s4  ;;  %v1251_v4 = vld [vmem:[%s1233_s30 + $0x31] sm:$0xff]  ;;  %721 = vmatpush.msra.mxu0 %v681_v56 }
  0x1b   : > { %v231_v2 = vld [vmem:[%s1233_s30 + $0x1] sm:$0xff]  ;;  %317 = vrot.lane.b32.xlu1 %v1239_v1, %s1140_s4  ;;  %v232_v5 = vld [vmem:[%s1233_s30 + $0x11] sm:$0xff]  ;;  %970 = vmatpush.msra.mxu1 %v681_v56 }
  0x1c   : > { %313 = vrot.lane.b32.xlu0 %v231_v2, %s1140_s4  ;;  %v239_v6 = vld [vmem:[%s1233_s30 + $0x2] sm:$0xff]  ;;  %v1261_v7 = vld [vmem:[%s1233_s30 + $0x71] sm:$0xff]  ;;  %974 = vmatpush.msra.mxu2 %v680_v58 }
  0x1d   : > { %v237_v8 = vld [vmem:[%s1233_s30 + $0x61] sm:$0xff]  ;;  %v240_v11 = vld [vmem:[%s1233_s30 + $0x12] sm:$0xff]  ;;  %975 = vmatpush.msra.mxu3 %v680_v58  ;;  %722 = vmatpush.msra.mxu0 %v680_v58 }
  0x1e   : > { %v245_v9 = vld [vmem:[%s1233_s30 + $0x62] sm:$0xff]  ;;  %v1278_v12 = vld [vmem:[%s1233_s30 + $0x70] sm:$0xff]  ;;  %977 = vmatpush.msra.mxu2 %v679_v59  ;;  %973 = vmatpush.msra.mxu1 %v680_v58  ;;  %v677_v2 = vld [vmem:[%s1638_s2 + $0x18] sm:$0xff] }
  0x1f   : > { %v1270_v10 = vld [vmem:[%s1233_s30 + $0x42] sm:$0xff]  ;;  %v1281_v13 = vld [vmem:[%s1233_s30 + $0x50] sm:$0xff]  ;;  %978 = vmatpush.msra.mxu3 %v679_v59  ;;  %723 = vmatpush.msra.mxu0 %v679_v59 }
  0x20   : > { %v1290_v14 = vld [vmem:[%s1233_s30 + $0x72] sm:$0xff]  ;;  %v923_v16 = vld [vmem:[%s1233_s30 + $0x80] sm:$0xff]  ;;  %980 = vmatpush.msra.mxu2 %v678_v63  ;;  %976 = vmatpush.msra.mxu1 %v679_v59 }
  0x21   : > { %v1293_v15 = vld [vmem:[%s1233_s30 + $0x52] sm:$0xff]  ;;  %v1303_v17 = vld [vmem:[%s1233_s30 + $0x60] sm:$0xff]  ;;  %981 = vmatpush.msra.mxu3 %v678_v63  ;;  %724 = vmatpush.msra.mxu0 %v678_v63 }
  0x22   : > { %323 = vrot.lane.b32.xlu2 %v1248_v3, %s1140_s4  ;;  %v1310_v18 = vld [vmem:[%s1233_s30 + $0x22] sm:$0xff]  ;;  %v1318_v20 = vld [vmem:[%s1233_s30 + $0x30] sm:$0xff]  ;;  %983 = vmatpush.msra.mxu2 %v677_v2 }
  0x23   : > { %319 = vrot.lane.b32.xlu1 %v1251_v4, %s1140_s4  ;;  %v931_v19 = vld [vmem:[%s1233_s30 + $0x81] sm:$0xff]  ;;  %v893_v21 = vld [vmem:[%s1233_s30 + $0x10] sm:$0xff]  ;;  %979 = vmatpush.msra.mxu1 %v678_v63 }
  0x24   : > { %315 = vrot.lane.b32.xlu0 %v232_v5, %s1140_s4  ;;  %v939_v22 = vld [vmem:[%s1233_s30 + $0x82] sm:$0xff]  ;;  %v947_v23 = vld [vmem:[%s1330_s23 + $0x210] sm:$0xff]  ;;  %984 = vmatpush.msra.mxu3 %v677_v2 }
  0x25   : > { %v945_v24 = vld [vmem:[%s1330_s23 + $0x1f0] sm:$0xff]  ;;  %v1348_v26 = vld [vmem:[%s1233_s30 + $0x40] sm:$0xff]  ;;  %725 = vmatpush.msra.mxu0 %v677_v2  ;;  %982 = vmatpush.msra.mxu1 %v677_v2 }
  0x26   : > { %v1355_v28 = vld [vmem:[%s1233_s30 + $0x32] sm:$0xff]  ;;  %v917_v30 = vld [vmem:[%s1233_s30 + $0x20] sm:$0xff] }
  0x27   : > { %v223_v32 = vld [vmem:[%s1233_s30] sm:$0xff]  ;;  %v924_v38 = vld [vmem:[%s1233_s30 + $0x90] sm:$0xff] }
  0x28   : > { %v932_v44 = vld [vmem:[%s1233_s30 + $0x91] sm:$0xff] }
  0x29   : > { %v943_v48 = vld [vmem:[%s1330_s23 + $0x1d0] sm:$0xff] }
  0x2a   : > { %345 = vrot.lane.b32.xlu2 %v239_v6, %s1141_s5  ;;  %v941_v49 = vld [vmem:[%s1330_s23 + $0x1b0] sm:$0xff]  ;;  %v948_v6 = vld [vmem:[%s1330_s23 + $0x220] sm:$0xff] }
  0x2b   : > { %327 = vrot.lane.b32.xlu1 %v1261_v7, %s1140_s4  ;;  %v940_v57 = vld [vmem:[%s1233_s30 + $0x92] sm:$0xff] }
  0x2c   : > { %325 = vrot.lane.b32.xlu0 %v237_v8, %s1140_s4 }
  0x32   : > { %357 = vrot.lane.b32.xlu2 %v245_v9, %s1141_s5 }
  0x33   : > { %353 = vrot.lane.b32.xlu1 %v1270_v10, %s1141_s5 }
  0x34   : > { %347 = vrot.lane.b32.xlu0 %v240_v11, %s1141_s5 }
  0x3a   : > { %417 = vrot.lane.b32.xlu2 %v1248_v3, %s1142_s6 }
  0x3b   : > { %389 = vrot.lane.b32.xlu1 %v1278_v12, %s1143_s7 }
  0x3c   : > { %385 = vrot.lane.b32.xlu0 %v1281_v13, %s1143_s7 }
  0x42   : > { %453 = vrot.lane.b32.xlu2 %v1290_v14, %s1144_s8 }
  0x43   : > { %449 = vrot.lane.b32.xlu1 %v1293_v15, %s1144_s8 }
  0x44   : > { %421 = vrot.lane.b32.xlu0 %v1261_v7, %s1142_s6 }
  0x4a   : > { %513 = vrot.lane.b32.xlu2 %v237_v8, %s1145_s9 }
  0x4b   : > { %485 = vrot.lane.b32.xlu1 %v923_v16, %s1146_s10 }
  0x4c   : > { %481 = vrot.lane.b32.xlu0 %v1303_v17, %s1146_s10 }
  0x52   : > { %545 = vrot.lane.b32.xlu2 %v245_v9, %s1147_s11 }
  0x53   : > { %349 = vrot.lane.b32.xlu1 %v1310_v18, %s1141_s5 }
  0x54   : > { %517 = vrot.lane.b32.xlu0 %v931_v19, %s1145_s9 }
  0x5a   : > { %381 = vrot.lane.b32.xlu2 %v1318_v20, %s1143_s7 }
  0x5b   : > { %377 = vrot.lane.b32.xlu1 %v893_v21, %s1143_s7 }
  0x5c   : > { %549 = vrot.lane.b32.xlu0 %v939_v22, %s1147_s11 }
  0x62   : > { %355 = vrot.lane.b32.xlu2 %v1293_v15, %s1141_s5 }
  0x63   : > { %581 = vrot.lane.b32.xlu1 %v947_v23, %s1148_s26 }
  0x64   : > { %577 = vrot.lane.b32.xlu0 %v945_v24, %s1148_s26 }
  0x6a   : > { %413 = vrot.lane.b32.xlu2 %v1251_v4, %s1142_s6 }
  0x6b   : > { %409 = vrot.lane.b32.xlu1 %v232_v5, %s1142_s6  ;;  %v946_v5 = vld [vmem:[%s1330_s23 + $0x200] sm:$0xff] }
  0x6c   : > { %359 = vrot.lane.b32.xlu0 %v1290_v14, %s1141_s5 }
  0x72   : > { %441 = vrot.lane.b32.xlu2 %v240_v11, %s1144_s8 }
  0x73   : > { %391 = vrot.lane.b32.xlu1 %v923_v16, %s1143_s7  ;;  %v674_v16 = vld [vmem:[%s1638_s2] sm:$0xff] }
  0x74   : > { %387 = vrot.lane.b32.xlu0 %v1303_v17, %s1143_s7  ;;  %v322_v25 = vpop.permute.xlu2 %321 }
  0x75   : > { %v1352_v27 = vsel %vm593_vm0, %v1348_v26, %v322_v25 }
  0x7a   : > { %423 = vrot.lane.b32.xlu2 %v931_v19, %s1142_s6 }
  0x7b   : > { %419 = vrot.lane.b32.xlu1 %v237_v8, %s1142_s6  ;;  %v675_v8 = vld [vmem:[%s1638_s2 + $0x8] sm:$0xff] }
  0x7c   : > { %445 = vrot.lane.b32.xlu0 %v1355_v28, %s1144_s8  ;;  %v1361_v29 = vpop.permute.xlu2 %323 }
  0x7d   : > { %v599_v19 = vsel %vm593_vm0, %v1281_v13, %v1361_v29 }
  0x82   : > { %451 = vrot.lane.b32.xlu2 %v245_v9, %s1144_s8 }
  0x83   : > { %477 = vrot.lane.b32.xlu1 %v1348_v26, %s1146_s10 }
  0x84   : > { %473 = vrot.lane.b32.xlu0 %v917_v30, %s1146_s10  ;;  %v346_v31 = vpop.permute.xlu2 %345 }
  0x8a   : > { %509 = vrot.lane.b32.xlu2 %v1236_v0, %s1145_s9 }
  0x8b   : > { %505 = vrot.lane.b32.xlu1 %v1239_v1, %s1145_s9 }
  0x8c   : > { %455 = vrot.lane.b32.xlu0 %v939_v22, %s1144_s8  ;;  %v1374_v33 = vpop.permute.xlu2 %357 }
  0x8d   : > { %v318_v34 = vpop.permute.xlu1 %317 }
  0x8e   : > { %v1377_v35 = vsel %vm593_vm0, %v917_v30, %v318_v34  ;;  %v314_v36 = vpop.permute.xlu0 %313 }
  0x8f   : > { %v594_v37 = vsel %vm593_vm0, %v223_v32, %v314_v36  ;;  %v944_v36 = vld [vmem:[%s1330_s23 + $0x1e0] sm:$0xff] }
  0x90   : > { %v1382_v39 = vsel %vm602_vm1, %v594_v37, %v346_v31 }
  0x92   : > { %537 = vrot.lane.b32.xlu2 %v1310_v18, %s1147_s11 }
  0x93   : > { %487 = vrot.lane.b32.xlu1 %v924_v38, %s1146_s10 }
  0x94   : > { %483 = vrot.lane.b32.xlu0 %v1278_v12, %s1146_s10  ;;  %v1389_v40 = vpop.permute.xlu2 %417 }
  0x95   : > { %v1391_v41 = vpop.permute.xlu1 %319 }
  0x96   : > { %v316_v42 = vpop.permute.xlu0 %315 }
  0x97   : > { %v595_v43 = vsel %vm593_vm0, %v893_v21, %v316_v42 }
  0x9a   : > { %519 = vrot.lane.b32.xlu2 %v932_v44, %s1145_s9 }
  0x9b   : > { %515 = vrot.lane.b32.xlu1 %v1261_v7, %s1145_s9  ;;  %v676_v7 = vld [vmem:[%s1638_s2 + $0x10] sm:$0xff] }
  0x9c   : > { %541 = vrot.lane.b32.xlu0 %v1270_v10, %s1147_s11  ;;  %v1400_v45 = vpop.permute.xlu2 %453  ;;  %986 = vmatpush.msra.mxu2 %v676_v7 }
  0x9d   : > { %v1402_v46 = vpop.permute.xlu1 %327  ;;  %987 = vmatpush.msra.mxu3 %v676_v7  ;;  %726 = vmatpush.msra.mxu0 %v676_v7 }
  0x9e   : > { %v1404_v47 = vpop.permute.xlu0 %325  ;;  %989 = vmatpush.msra.mxu2 %v675_v8  ;;  %985 = vmatpush.msra.mxu1 %v676_v7 }
  0x9f   : > { %990 = vmatpush.msra.mxu3 %v675_v8  ;;  %727 = vmatpush.msra.mxu0 %v675_v8  ;;  %v600_v29 = vsel %vm593_vm0, %v1303_v17, %v1404_v47 }
  0xa0   : > { %992 = vmatpush.msra.mxu2 %v674_v16  ;;  %988 = vmatpush.msra.mxu1 %v675_v8  ;;  %v609_v17 = vsel %vm602_vm1, %v600_v29, %v1374_v33 }
  0xa1   : > { %993 = vmatpush.msra.mxu3 %v674_v16  ;;  %728 = vmatpush.msra.mxu0 %v674_v16 }
  0xa2   : > { %351 = vrot.lane.b32.xlu2 %v1355_v28, %s1141_s5  ;;  %991 = vmatpush.msra.mxu1 %v674_v16 }
  0xa3   : > { %573 = vrot.lane.b32.xlu1 %v943_v48, %s1148_s26 }
  0xa4   : > { %569 = vrot.lane.b32.xlu0 %v941_v49, %s1148_s26  ;;  %v1415_v51 = vpop.permute.xlu2 %513 }
  0xa5   : > { %v1417_v52 = vpop.permute.xlu1 %353 }
  0xa6   : > { %v348_v53 = vpop.permute.xlu0 %347 }
  0xa7   : > { %v1423_v55 = vsel %vm602_vm1, %v595_v43, %v348_v53 }
  0xaa   : > { %379 = vrot.lane.b32.xlu2 %v917_v30, %s1143_s7 }
  0xab   : > { %551 = vrot.lane.b32.xlu1 %v940_v57, %s1147_s11 }
  0xac   : > { %547 = vrot.lane.b32.xlu0 %v1290_v14, %s1147_s11  ;;  %v1439_v60 = vpop.permute.xlu2 %545 }
  0xad   : > { %v1441_v61 = vpop.permute.xlu1 %389 }
  0xae   : > { %v386_v62 = vpop.permute.xlu0 %385  ;;  %v618_v30 = vsel %vm611_vm3, %v609_v17, %v1441_v61 }
  0xb2   : > { %583 = vrot.lane.b32.xlu2 %v948_v6, %s1148_s26 }
  0xb3   : > { %579 = vrot.lane.b32.xlu1 %v946_v5, %s1148_s26 }
  0xb4   : > { %383 = vrot.lane.b32.xlu0 %v1348_v26, %s1143_s7  ;;  %v382_v9 = vpop.permute.xlu2 %381 }
  0xb5   : > { %v450_v11 = vpop.permute.xlu1 %449 }
  0xb6   : > { %v422_v14 = vpop.permute.xlu0 %421 }
  0xba   : > { %443 = vrot.lane.b32.xlu2 %v1310_v18, %s1144_s8 }
  0xbb   : > { %415 = vrot.lane.b32.xlu1 %v1236_v0, %s1142_s6 }
  0xbc   : > { %411 = vrot.lane.b32.xlu0 %v1239_v1, %s1142_s6  ;;  %v356_v21 = vpop.permute.xlu2 %355  ;;  %s205_s6 = sand.u32 1, %s1122_s13  }
  0xbd   : > { %v486_v22 = vpop.permute.xlu1 %485  ;;  %v1474_v23 = vsel %vm602_vm1, %v599_v19, %v356_v21  ;;  %s890_s7 = sshll.u32 %s205_s6, 6  ;;  %s763_s19 = scalar_lea.sflag [#allocation3], %s205_s6 }
  0xbe   : > { %v482_v24 = vpop.permute.xlu0 %481 }
  0xc2   : > { %479 = vrot.lane.b32.xlu2 %v1281_v13, %s1146_s10  ;;  %v607_v13 = vsel %vm602_vm1, %v1352_v27, %v1417_v52 }
  0xc3   : > { %475 = vrot.lane.b32.xlu1 %v1318_v20, %s1146_s10 }
  0xc4   : > { %447 = vrot.lane.b32.xlu0 %v1270_v10, %s1144_s8  ;;  %v1482_v0 = vpop.permute.xlu2 %413  ;;  %v616_v10 = vsel %vm611_vm3, %v607_v13, %v386_v62  ;;  %s207_s8 = scalar_lea.vmem [#allocation2], %s890_s7 }
  0xc5   : > { %v350_v1 = vpop.permute.xlu1 %349 }
  0xc6   : > { %v605_v18 = vsel %vm602_vm1, %v1377_v35, %v350_v1  ;;  %v518_v25 = vpop.permute.xlu0 %517  ;;  %v942_v35 = vld [vmem:[%s1330_s23 + $0x1c0] sm:$0xff] }
  0xc7   : > { %v1487_v26 = vsel %vm611_vm3, %v605_v18, %v382_v9 }
  0xca   : > { %539 = vrot.lane.b32.xlu2 %v1355_v28, %s1147_s11 }
  0xcb   : > { %511 = vrot.lane.b32.xlu1 %v1248_v3, %s1145_s9  ;;  %v625_v3 = vsel %vm620_vm4, %v616_v10, %v1389_v40 }
  0xcc   : > { %507 = vrot.lane.b32.xlu0 %v1251_v4, %s1145_s9  ;;  %v442_v31 = vpop.permute.xlu2 %441  ;;  %v634_v34 = vsel %vm629_vm5, %v625_v3, %v450_v11  ;;  %v627_v4 = vsel %vm620_vm4, %v618_v30, %v422_v14  ;;  %v623_v11 = vsel %vm620_vm4, %v1487_v26, %v1482_v0  ;;  %s963_s9 = sshll.u32 %s1130_s15, 6 }
  0xcd   : > { %v378_v27 = vpop.permute.xlu1 %377  ;;  %v643_v33 = vsel %vm638_vm6, %v634_v34, %v482_v24  ;;  %v636_v37 = vsel %vm629_vm5, %v627_v4, %v1400_v45  ;;  %s775_s23 = scalar_lea.hbm %s1639_s3, %s963_s9 }
  0xce   : > { %v612_v28 = vsel %vm611_vm3, %v1382_v39, %v378_v27  ;;  %v550_v32 = vpop.permute.xlu0 %549  ;;  %v645_v38 = vsel %vm638_vm6, %v636_v37, %v486_v22  ;;  %v652_v40 = vsel %vm647_vm7, %v643_v33, %v1415_v51  ;;  %v601_v22 = vsel %vm593_vm0, %v1278_v12, %v1402_v46  ;;  %s778_s5 = sshll.u32 %s775_s23, 4  ;;  %s779_s5 = int_to_ptr.hbm [resolvable:$true] %s778_s5 }
  0xcf   : > { %v654_v39 = vsel %vm647_vm7, %v645_v38, %v518_v25  ;;  %v661_v45 = vsel %vm656_vm8, %v652_v40, %v1439_v60  ;;  %s1074_s21 = sshra.s32 %s779_s5, 4  ;;  %s1075_s21 = int_to_ptr.hbm [resolvable:$true] %s1074_s21 }
  0xd0   : > { %v663_v42 = vsel %vm656_vm8, %v654_v39, %v550_v32  ;;  %s1076_s27 = scalar_lea.hbm %s1075_s21, 64  ;;  %p1081_p1 = scmp.lt.s32.totalorder %s1075_s21, %s1639_s3 }
  0xd1   : > { %p1077_p12 = scmp.ne.s32.totalorder %s1075_s21, %s1076_s27  ;;  %p1082_p2 = scmp.lt.s32.totalorder %s1080_s28, %s1076_s27 }
  0xd2   : > { %575 = vrot.lane.b32.xlu2 %v944_v36, %s1148_s26 }
  0xd3   : > { %571 = vrot.lane.b32.xlu1 %v942_v35, %s1148_s26  ;;  %s776_s26 = sshll.u32 %s207_s8, 4  ;;  %p1078_p13 = pnand %p1077_p12, %p1210_p4  ;;  %s777_s26 = int_to_ptr.vmem [resolvable:$true] %s776_s26 }
  0xd4   : > { %543 = vrot.lane.b32.xlu0 %v1293_v15, %s1147_s11  ;;  %v424_v49 = vpop.permute.xlu2 %423  ;;  %p1083_p3 = por %p1082_p2, %p1081_p1 }
  0xd5   : > { %v582_v43 = vpop.permute.xlu1 %581  ;;  %p1079_p0 = pneg %p1078_p13 }
  0xd6   : > { %v578_v44 = vpop.permute.xlu0 %577  ;;  %v672_v47 = vsel %vm665_vm9, %v663_v42, %v582_v43 }
  0xd7   : > { %v670_v48 = vsel %vm665_vm9, %v661_v45, %v578_v44  ;;  %956 = vmatmul.msk.f32.vlgmr.msra.gmra.mxu3 %vm684_vm10, %v672_v47  ;;  %p1084_p5 = pnand %p1083_p3, %p1079_p0 }
  0xd8   : > { %954 = vmatmul.msk.f32.vlgmr.msra.gmra.mxu2 %vm684_vm10, %v670_v48 }
  0xdc   : > { %v452_v15 = vpop.permute.xlu2 %451 }
  0xdd   : > { %v410_v50 = vpop.permute.xlu1 %409 }
  0xde   : > { %v360_v51 = vpop.permute.xlu0 %359  ;;  %v621_v8 = vsel %vm620_vm4, %v612_v28, %v410_v50 }
  0xdf   : > { %v630_v19 = vsel %vm629_vm5, %v621_v8, %v442_v31  ;;  %v610_v1 = vsel %vm602_vm1, %v601_v22, %v360_v51 }
  0xe4   : > { %v510_v54 = vpop.permute.xlu2 %509 }
  0xe5   : > { %v392_v52 = vpop.permute.xlu1 %391 }
  0xe6   : > { %v388_v53 = vpop.permute.xlu0 %387  ;;  %v619_v0 = vsel %vm611_vm3, %v610_v1, %v392_v52 }
  0xe7   : > { %v628_v12 = vsel %vm620_vm4, %v619_v0, %v424_v49  ;;  %v617_v32 = vsel %vm611_vm3, %v1474_v23, %v388_v53  ;;  %v597_v53 = vsel %vm593_vm0, %v1318_v20, %v1391_v41 }
  0xec   : > { %v538_v59 = vpop.permute.xlu2 %537 }
  0xed   : > { %v420_v56 = vpop.permute.xlu1 %419 }
  0xee   : > { %v446_v57 = vpop.permute.xlu0 %445  ;;  %v626_v33 = vsel %vm620_vm4, %v617_v32, %v420_v56 }
  0xef   : > { %v632_v14 = vsel %vm629_vm5, %v623_v11, %v446_v57  ;;  %v635_v36 = vsel %vm629_vm5, %v626_v33, %v452_v15 }
  0xf4   : > { %v520_v63 = vpop.permute.xlu2 %519 }
  0xf5   : > { %v478_v58 = vpop.permute.xlu1 %477 }
  0xf6   : > { %v474_v60 = vpop.permute.xlu0 %473  ;;  %v641_v16 = vsel %vm638_vm6, %v632_v14, %v478_v58 }
  0xf7   : > { %v639_v21 = vsel %vm638_vm6, %v630_v19, %v474_v60  ;;  %v650_v25 = vsel %vm647_vm7, %v641_v16, %v510_v54 }
  0xfc   : > { %v352_v6 = vpop.permute.xlu2 %351 }
  0xfd   : > { %v506_v61 = vpop.permute.xlu1 %505  ;;  %v606_v56 = vsel %vm602_vm1, %v597_v53, %v352_v6 }
  0xfe   : > { %v456_v62 = vpop.permute.xlu0 %455  ;;  %v648_v24 = vsel %vm647_vm7, %v639_v21, %v506_v61 }
  0xff   : > { %v657_v10 = vsel %vm656_vm8, %v648_v24, %v538_v59  ;;  %v637_v46 = vsel %vm629_vm5, %v628_v12, %v456_v62 }
 0x104   : > { %v380_v18 = vpop.permute.xlu2 %379 }
 0x105   : > { %v488_v2 = vpop.permute.xlu1 %487  ;;  %v613_v51 = vsel %vm611_vm3, %v1423_v55, %v380_v18 }
 0x106   : > { %v484_v5 = vpop.permute.xlu0 %483  ;;  %v646_v30 = vsel %vm638_vm6, %v637_v46, %v488_v2 }
 0x107   : > { %v655_v28 = vsel %vm647_vm7, %v646_v30, %v520_v63  ;;  %v644_v37 = vsel %vm638_vm6, %v635_v36, %v484_v5 }
 0x10c   : > { %v584_v3 = vpop.permute.xlu2 %583 }
 0x10d   : > { %v516_v7 = vpop.permute.xlu1 %515 }
 0x10e   : > { %v542_v9 = vpop.permute.xlu0 %541  ;;  %v653_v38 = vsel %vm647_vm7, %v644_v37, %v516_v7 }
 0x10f   : > { %v659_v26 = vsel %vm656_vm8, %v650_v25, %v542_v9 }
 0x114   : > { %v444_v43 = vpop.permute.xlu2 %443 }
 0x115   : > { %v574_v29 = vpop.permute.xlu1 %573 }
 0x116   : > { %v570_v13 = vpop.permute.xlu0 %569  ;;  %v668_v17 = vsel %vm665_vm9, %v659_v26, %v574_v29 }
 0x117   : > { %v666_v27 = vsel %vm665_vm9, %v657_v10, %v570_v13  ;;  %952 = vmatmul.msk.f32.vlgmr.msra.gmra.mxu1 %vm684_vm10, %v668_v17 }
 0x118   : > { %950 = vmatmul.msk.f32.vlgmr.msra.gmra.mxu0 %vm684_vm10, %v666_v27 }
 0x11c   : > { %v480_v47 = vpop.permute.xlu2 %479 }
 0x11d   : > { %v552_v31 = vpop.permute.xlu1 %551 }
 0x11e   : > { %v664_v34 = vsel %vm656_vm8, %v655_v28, %v552_v31  ;;  %v548_v4 = vpop.permute.xlu0 %547 }
 0x11f   : > { %v673_v35 = vsel %vm665_vm9, %v664_v34, %v584_v3  ;;  %v662_v40 = vsel %vm656_vm8, %v653_v38, %v548_v4 }
 0x120   : > { %957 = vmatmul.msk.f32.gmra.mxu3 %vm684_vm10, %v673_v35 }
 0x124   : > { %v540_v50 = vpop.permute.xlu2 %539 }
 0x125   : > { %v580_v39 = vpop.permute.xlu1 %579 }
 0x126   : > { %v384_v42 = vpop.permute.xlu0 %383  ;;  %v671_v23 = vsel %vm665_vm9, %v662_v40, %v580_v39 }
 0x127   : > { %955 = vmatmul.msk.f32.gmra.mxu2 %vm684_vm10, %v671_v23  ;;  %v615_v57 = vsel %vm611_vm3, %v606_v56, %v384_v42 }
 0x12c   : > { %v576_v63 = vpop.permute.xlu2 %575 }
 0x12d   : > { %v416_v44 = vpop.permute.xlu1 %415 }
 0x12e   : > { %v412_v45 = vpop.permute.xlu0 %411  ;;  %v624_v59 = vsel %vm620_vm4, %v615_v57, %v416_v44 }
 0x12f   : > { %v622_v15 = vsel %vm620_vm4, %v613_v51, %v412_v45 }
 0x130   : > { %v631_v58 = vsel %vm629_vm5, %v622_v15, %v444_v43 }
 0x135   : > { %v476_v48 = vpop.permute.xlu1 %475 }
 0x136   : > { %v448_v49 = vpop.permute.xlu0 %447  ;;  %v640_v60 = vsel %vm638_vm6, %v631_v58, %v476_v48 }
 0x137   : > { %v633_v55 = vsel %vm629_vm5, %v624_v59, %v448_v49 }
 0x138   : > { %v642_v62 = vsel %vm638_vm6, %v633_v55, %v480_v47 }
 0x13d   : > { %v512_v52 = vpop.permute.xlu1 %511 }
 0x13e   : > { %v508_v54 = vpop.permute.xlu0 %507  ;;  %v651_v2 = vsel %vm647_vm7, %v642_v62, %v512_v52 }
 0x13f   : > { %v649_v61 = vsel %vm647_vm7, %v640_v60, %v508_v54 }
 0x140   : > { %v658_v20 = vsel %vm656_vm8, %v649_v61, %v540_v50 }
 0x145   : > { %v572_v41 = vpop.permute.xlu1 %571 }
 0x146   : > { %v544_v5 = vpop.permute.xlu0 %543  ;;  %v667_v6 = vsel %vm665_vm9, %v658_v20, %v572_v41 }
 0x147   : > { %v660_v7 = vsel %vm656_vm8, %v651_v2, %v544_v5  ;;  %951 = vmatmul.msk.f32.gmra.mxu0 %vm684_vm10, %v667_v6 }
 0x148   : > { %v669_v8 = vsel %vm665_vm9, %v660_v7, %v576_v63 }
 0x149   : > { %953 = vmatmul.msk.f32.gmra.mxu1 %vm684_vm10, %v669_v8 }
 0x15a   : > { %v748_v9 = vpop.f32.mrf.mxu3 }
 0x15b   : > { %v742_v11 = vpop.f32.mrf.mxu2  ;;  %760 = vst.msk [vmem:[%s207_s8 + $0x30] sm:$0xff] %vm593_vm0, %v748_v9 }
 0x15c   : > { %758 = vst.msk [vmem:[%s207_s8 + $0x20] sm:$0xff] %vm593_vm0, %v742_v11 }
 0x194   : > { %v736_v14 = vpop.f32.mrf.mxu1 }
 0x195   : > { %v730_v16 = vpop.f32.mrf.mxu0  ;;  %756 = vst.msk [vmem:[%s207_s8 + $0x10] sm:$0xff] %vm593_vm0, %v736_v14 }
 0x196   : > { %754 = vst.msk [vmem:[%s207_s8] sm:$0xff] %vm593_vm0, %v730_v16 }
 0x1a3   : > { %v751_v19 = vpop.f32.mrf.mxu3 }
 0x1a4   : > { %761 = vst.msk [vmem:[%s207_s8 + $0x38] sm:$0xff] %vm593_vm0, %v751_v19 }
 0x1aa   : > { %v745_v21 = vpop.f32.mrf.mxu2 }
 0x1ab   : > { %759 = vst.msk [vmem:[%s207_s8 + $0x28] sm:$0xff] %vm593_vm0, %v745_v21 }
 0x1c4   : > { %v733_v22 = vpop.f32.mrf.mxu0 }
 0x1c5   : > { %755 = vst.msk [vmem:[%s207_s8 + $0x8] sm:$0xff] %vm593_vm0, %v733_v22 }
 0x1c6   : > { %v739_v24 = vpop.f32.mrf.mxu1 }
 0x1c7   : > { %757 = vst.msk [vmem:[%s207_s8 + $0x18] sm:$0xff] %vm593_vm0, %v739_v24 }
 0x1c8   : > { %1087 = shalt.err (!%p1084_p5)
}
 0x1c9   : > { %s1149_s6 = smov 128  }
 0x1ca   : > { %995 = dma.vmem_to_hbm [thread:$0]  (%p1210_p4), %s777_s26, 1024, %s779_s5, %s763_s19, %s1149_s6, %s1149_s6, %s1140_s4  }
 0x1cb PF: > { %p1001_p6 = scmp.ge.s32.totalorder %s1138_s17, 2  ;;  %s793_s7 = sand.u32 1, %s1118_s12  }
 0x1cc   : > { %s794_s8 = scalar_lea.sflag [#allocation3], %s793_s7 }
 0x1cd   : > { %p998_p7 = pnand %p1001_p6, %p1217_p8 }
 0x1cf   : > { %p999_p9 = pneg %p998_p7 }
 0x1d1   : > { %1113 = dma.done.wait (%p999_p9), %s794_s8, 1024  }
 0x1d2   : > { %1115 = vsyncadd (%p999_p9), %s794_s8, 4294966272  ;;  %s16_s17 = sadd.s32 1, %s1138_s17   ;;  %s1642_s12 = smov %s1122_s13 }
 0x1d3   : > { %p13_p10 = scmp.ge.s32.totalorder %s16_s17, 4   ;;  %s1643_s13 = smov %s1126_s14 }
 0x1d4   : > { %s1644_s14 = smov %s1223_s25  ;;  %s1645_s15 = smov %s1134_s16 }
 0x1d5   : > { %s1646_s16 = smov %s1648_s20  ;;  %15 = sbr.rel (!%p13_p10) target bundleno = 4 (0x4), region = 75 }
 0x1da   :  { %800 = vsyncpa [#allocation3], 1 }
 0x1db   :  { %802 = vsyncpa [#allocation3 + $0x1], 1 }

</bundles_post_ra>
